<compile_context>
chip_gen: v7x
topology: tpu7x:2x2x1
jax: 0.10.0
libtpu: 0.0.40
codegen_flags: <defaults>
</compile_context>

<pallas_src>
import functools

import jax
import jax.numpy as jnp
from jax.experimental import pallas as pl
from jax.experimental.pallas import tpu as pltpu


# -----------------------------------------------------------------------------
# Pallas kernel: full GGNN forward for one batch tile (Bt graphs).
# -----------------------------------------------------------------------------
def ggnn_kernel(state_ref, q_ref, a_ref,
                w_edge_ref, b_edge_ref, w_ga_ref, w_rz_ref, w_t_ref,
                rg_b_ref, ug_b_ref, tr_b_ref,
                o1_ws_ref, o1_wq_ref, o1_b_ref, o2_w_ref, o2_b_ref,
                out_ref, s3_ref,
                *, n_node, n_edge_types, state_dim, n_steps, b_tile,
                compute_dtype):
    N, E, D, Bt = n_node, n_edge_types, state_dim, b_tile

    def dot(x, w):
        return jnp.dot(x.astype(compute_dtype), w,
                       preferred_element_type=jnp.float32)

    # ---- hoisted loads; weights were pre-cast to compute_dtype in the wrapper
    w_edge = w_edge_ref[...]     # (D, 2*E*D)  columns per edge e: [in_e | out_e]
    b_edge = b_edge_ref[...]     # (1, 2*E*D)  f32
    w_ga = w_ga_ref[...]         # (2D, 3D)    [reset | update | transform]
    w_rz = w_rz_ref[...]         # (D, 2D)     state part of reset/update
    w_t = w_t_ref[...]           # (D, D)      state part of transform
    b_r = rg_b_ref[...]
    b_u = ug_b_ref[...]
    b_t = tr_b_ref[...]
    a_blk = a_ref[...]           # (Bt, N, E*N) — loaded once, no per-edge copies

    state = state_ref[...]       # (Bt*N, D) f32 — elementwise math stays f32

    def step(_, s):
        # fused per-edge in/out linears: one lane-dense matmul
        S = dot(s, w_edge) + b_edge                           # (Bt*N, 2*E*D) f32
        S2 = S.reshape(Bt, N, 2 * E * D).astype(compute_dtype)
        # stage into edge-major rows (e*N + n) so the aggregation below is a
        # single contraction of length K = E*N against the adjacency block
        for e in range(E):
            s3_ref[:, e * N:(e + 1) * N, :] = S2[:, :, 2 * e * D:2 * (e + 1) * D]
        agg = jnp.einsum('bnm,bmk->bnk', a_blk, s3_ref[...],
                         preferred_element_type=jnp.float32
                         ).reshape(Bt * N, 2 * D)             # [a_in | a_out]

        # fused gates: 3 matmuls instead of 9
        g_a = dot(agg, w_ga)                                  # (Bt*N, 3D)
        g_s = dot(s, w_rz)                                    # (Bt*N, 2D)
        r = jax.nn.sigmoid(g_a[:, :D] + g_s[:, :D] + b_r)
        z = jax.nn.sigmoid(g_a[:, D:2 * D] + g_s[:, D:] + b_u)
        h_hat = jnp.tanh(g_a[:, 2 * D:] + dot(r * s, w_t) + b_t)
        return s + z * (h_hat - s)                            # == (1-z)*s + z*h_hat

    if n_steps <= 4:
        for i in range(n_steps):                              # small: full unroll
            state = step(i, state)
    else:
        state = jax.lax.fori_loop(0, n_steps, step, state, unroll=2)

    # output head: Linear(D+Q -> D) -> tanh -> Linear(D -> C_pad), lane-dense
    h = jnp.tanh(dot(state, o1_ws_ref[...]) + dot(q_ref[...], o1_wq_ref[...])
                 + o1_b_ref[...])
    out_ref[...] = dot(h, o2_w_ref[...]) + o2_b_ref[...]


# -----------------------------------------------------------------------------
# Wrapper helpers
# -----------------------------------------------------------------------------
def _default_vmem_limit_bytes():
    # ~75% of physical VMEM: ≈96 MiB on v5e/v6e (128 MiB), ≈48 MiB on v7x (64 MiB)
    try:
        cap = int(pltpu.get_tpu_info().vmem_capacity_bytes)
        return min((cap * 3) // 4, 100 << 20)
    except Exception:
        return 48 << 20


def _pick_batch_tile(batch, n_node, per_graph_bytes, weight_bytes,
                     vmem_limit_bytes, target_rows=256):
    """Divisor of `batch`: smallest tile whose row count (Bt*N) reaches the MXU
    depth, never exceeding the VMEM activation budget."""
    budget = vmem_limit_bytes - weight_bytes - (8 << 20)
    cap = max(1, budget // max(per_graph_bytes, 1))
    want = max(1, -(-target_rows // n_node))                  # ceil(256 / N)
    divisors = [d for d in range(1, batch + 1) if batch % d == 0]
    fitting = [d for d in divisors if d <= cap] or [1]
    preferred = [d for d in fitting if d >= want]
    return min(preferred) if preferred else max(fitting)


# -----------------------------------------------------------------------------
# Wrapper
# -----------------------------------------------------------------------------
def ggnn_forward(prop_state, question, A, params, *, n_steps,
                 batch_tile=None, compute_dtype=jnp.float32,
                 adjacency_dtype=None, vmem_limit_bytes=None):
    B, N, D = prop_state.shape
    Q = question.shape[-1]
    E = params["in_w"].shape[0]
    C = params["o2_w"].shape[-1]
    C_pad = ((C + 127) // 128) * 128
    EN = E * N
    cd = jnp.dtype(compute_dtype)
    # adjacency entries are usually 0/1 so compute_dtype is exact; pass
    # adjacency_dtype=jnp.float32 explicitly for weighted/normalized A + bf16.
    ad = jnp.dtype(adjacency_dtype if adjacency_dtype is not None else compute_dtype)

    if vmem_limit_bytes is None:
        vmem_limit_bytes = _default_vmem_limit_bytes()

    # ---- fold weights into the fused layouts; pre-cast to compute_dtype ----
    w_edge = jnp.concatenate(
        [jnp.concatenate([params["in_w"][e], params["out_w"][e]], axis=1)
         for e in range(E)], axis=1).astype(cd)                       # (D, 2*E*D)
    b_edge = jnp.concatenate(
        [jnp.concatenate([params["in_b"][e], params["out_b"][e]], axis=1)
         for e in range(E)], axis=1)                                  # (1, 2*E*D) f32
    D2 = 2 * D
    w_ga = jnp.concatenate([params["rg_w"][:D2], params["ug_w"][:D2],
                            params["tr_w"][:D2]], axis=1).astype(cd)  # (2D, 3D)
    w_rz = jnp.concatenate([params["rg_w"][D2:], params["ug_w"][D2:]],
                           axis=1).astype(cd)                         # (D, 2D)
    w_t = params["tr_w"][D2:].astype(cd)                              # (D, D)
    o1_ws = params["o1_w"][:D].astype(cd)                             # (D, D)
    o1_wq = params["o1_w"][D:].astype(cd)                             # (Q, D)
    o2_w = jnp.pad(params["o2_w"], ((0, 0), (0, C_pad - C))).astype(cd)
    o2_b = jnp.pad(params["o2_b"], ((0, 0), (0, C_pad - C)))

    weights = [w_edge, b_edge, w_ga, w_rz, w_t,
               params["rg_b"], params["ug_b"], params["tr_b"],
               o1_ws, o1_wq, params["o1_b"], o2_w, o2_b]
    weight_bytes = sum(int(w.size) * w.dtype.itemsize for w in weights)

    # ---- batch tile: MXU-filling rows, bounded by the VMEM budget ----
    per_graph_bytes = (
        2 * N * EN * ad.itemsize                          # adjacency block (x2 buf)
        + 2 * N * (4 * D + cd.itemsize * Q + 4 * C_pad)   # state / question / out
        + EN * 2 * D * cd.itemsize                        # S3 staging scratch
        + N * (2 * E * D + 10 * D) * 4)                   # transient f32 values
    if batch_tile is None:
        Bt = _pick_batch_tile(B, N, per_graph_bytes, weight_bytes,
                              vmem_limit_bytes)
    else:
        Bt = max(1, min(B, batch_tile))
        while B % Bt:
            Bt -= 1
    grid = (B // Bt,)   # NOTE: on v7x prefer B//Bt even so both TCs get work

    # ---- activations: row slabs so matmuls see Bt*N-tall operands ----
    state2d = prop_state.reshape(B * N, D)                # carried in f32
    q2d = question.reshape(B * N, Q).astype(cd)
    # The model only ever reads A[:, :, :E*N] (same slice for in- and
    # out-aggregation, as in the reference).  If E*N is lane-aligned the
    # BlockSpec selects those columns directly from the full A (no extra
    # HBM->HBM copy); otherwise slice once in the wrapper.
    if A.shape[-1] == EN or EN % 128 == 0:
        A_use = A
    else:
        A_use = A[:, :, :EN]
    A_use = A_use.astype(ad)

    kernel = functools.partial(
        ggnn_kernel, n_node=N, n_edge_types=E, state_dim=D, n_steps=n_steps,
        b_tile=Bt, compute_dtype=cd)

    def row_spec(rows, cols):
        return pl.BlockSpec((rows, cols), lambda b: (b, 0))

    def const_spec(shape):
        nd = len(shape)
        idx = lambda b, _nd=nd: (0,) * _nd
        try:   # grid-constant weights: one VMEM copy instead of two
            return pl.BlockSpec(shape, idx, pipeline_mode=pl.Buffered(1))
        except (AttributeError, TypeError):
            return pl.BlockSpec(shape, idx)

    in_specs = ([row_spec(Bt * N, D),
                 row_spec(Bt * N, Q),
                 pl.BlockSpec((Bt, N, EN), lambda b: (b, 0, 0))]
                + [const_spec(w.shape) for w in weights])

    out = pl.pallas_call(
        kernel,
        out_shape=jax.ShapeDtypeStruct((B * N, C_pad), jnp.float32),
        grid=grid,
        in_specs=in_specs,
        out_specs=row_spec(Bt * N, C_pad),
        scratch_shapes=[pltpu.VMEM((Bt, EN, 2 * D), cd)],
        compiler_params=pltpu.CompilerParams(
            dimension_semantics=("parallel",),
            vmem_limit_bytes=int(vmem_limit_bytes)),
    )(state2d, q2d, A_use, *weights)

    return out.reshape(B, N, C_pad)[:, :, :C]


# -----------------------------------------------------------------------------
# Deterministic parameter init (xavier-uniform weights, zero biases, like ref)
# -----------------------------------------------------------------------------
def xavier_uniform(key, shape):
    fan_in, fan_out = shape[-2], shape[-1]
    bound = (6.0 / (fan_in + fan_out)) ** 0.5
    return jax.random.uniform(key, shape, jnp.float32, -bound, bound)


def init_params(key, state_dim, question_dim, n_edge_types, n_classes):
    D, Q, E, C = state_dim, question_dim, n_edge_types, n_classes
    ks = jax.random.split(key, 8)
    return {
        "in_w": xavier_uniform(ks[0], (E, D, D)),
        "in_b": jnp.zeros((E, 1, D), jnp.float32),
        "out_w": xavier_uniform(ks[1], (E, D, D)),
        "out_b": jnp.zeros((E, 1, D), jnp.float32),
        "rg_w": xavier_uniform(ks[2], (3 * D, D)),
        "rg_b": jnp.zeros((1, D), jnp.float32),
        "ug_w": xavier_uniform(ks[3], (3 * D, D)),
        "ug_b": jnp.zeros((1, D), jnp.float32),
        "tr_w": xavier_uniform(ks[4], (3 * D, D)),
        "tr_b": jnp.zeros((1, D), jnp.float32),
        "o1_w": xavier_uniform(ks[5], (D + Q, D)),
        "o1_b": jnp.zeros((1, D), jnp.float32),
        "o2_w": xavier_uniform(ks[6], (D, C)),
        "o2_b": jnp.zeros((1, C), jnp.float32),
    }


# -----------------------------------------------------------------------------
# Pure-JAX reference (mirrors the PyTorch forward exactly)
# -----------------------------------------------------------------------------
def ggnn_ref(prop_state, question, A, p, n_steps):
    E = p["in_w"].shape[0]
    B, N, D = prop_state.shape
    A_in = A[:, :, : N * E]          # reference reads this slice for in AND out
    state = prop_state
    for _ in range(n_steps):
        ins = jnp.concatenate(
            [state @ p["in_w"][e] + p["in_b"][e] for e in range(E)], axis=1)
        outs = jnp.concatenate(
            [state @ p["out_w"][e] + p["out_b"][e] for e in range(E)], axis=1)
        a_in = jnp.einsum("bne,bed->bnd", A_in, ins)
        a_out = jnp.einsum("bne,bed->bnd", A_in, outs)
        a = jnp.concatenate([a_in, a_out, state], axis=2)
        r = jax.nn.sigmoid(a @ p["rg_w"] + p["rg_b"])
        z = jax.nn.sigmoid(a @ p["ug_w"] + p["ug_b"])
        joined = jnp.concatenate([a_in, a_out, r * state], axis=2)
        h_hat = jnp.tanh(joined @ p["tr_w"] + p["tr_b"])
        state = (1.0 - z) * state + z * h_hat
    join = jnp.concatenate([state, question], axis=2)
    h = jnp.tanh(join @ p["o1_w"] + p["o1_b"])
    return h @ p["o2_w"] + p["o2_b"]


if __name__ == "__main__":
    # Small, forward-consistent shapes.
    B, N, D, Q, E, STEPS, C = 2, 8, 32, 16, 2, 3, 4

    key = jax.random.PRNGKey(0)
    k_p, k_s, k_q, k_a = jax.random.split(key, 4)

    params = init_params(k_p, D, Q, E, C)
    prop_state = jax.random.normal(k_s, (B, N, D), jnp.float32)
    question = jax.random.normal(k_q, (B, N, Q), jnp.float32)
    # Adjacency tensor: (B, N, 2*E*N) as in standard GGNN; the model only
    # reads the first E*N columns (for both in and out, as in the reference).
    A = jax.random.uniform(k_a, (B, N, 2 * E * N), jnp.float32)

    out = ggnn_forward(prop_state, question, A, params, n_steps=STEPS)
    out = jax.block_until_ready(out)

    ref = ggnn_ref(prop_state, question, A, params, STEPS)
    assert out.shape == (B, N, C), out.shape
    assert jnp.allclose(out, ref, atol=1e-2, rtol=1e-2), \
        float(jnp.max(jnp.abs(out - ref)))

    print("KERNEL_OK")
</pallas_src>

<mosaic_0001>
module attributes {stable_mosaic.version = 11 : i64} {
  func.func @ggnn_kernel(%arg0: i32, %arg1: memref<16x32xf32, #tpu.memory_space<vmem>>, %arg2: memref<16x16xf32, #tpu.memory_space<vmem>>, %arg3: memref<2x8x16xf32, #tpu.memory_space<vmem>>, %arg4: memref<32x128xf32, #tpu.memory_space<vmem>>, %arg5: memref<1x128xf32, #tpu.memory_space<vmem>>, %arg6: memref<64x96xf32, #tpu.memory_space<vmem>>, %arg7: memref<32x64xf32, #tpu.memory_space<vmem>>, %arg8: memref<32x32xf32, #tpu.memory_space<vmem>>, %arg9: memref<1x32xf32, #tpu.memory_space<vmem>>, %arg10: memref<1x32xf32, #tpu.memory_space<vmem>>, %arg11: memref<1x32xf32, #tpu.memory_space<vmem>>, %arg12: memref<32x32xf32, #tpu.memory_space<vmem>>, %arg13: memref<16x32xf32, #tpu.memory_space<vmem>>, %arg14: memref<1x32xf32, #tpu.memory_space<vmem>>, %arg15: memref<32x128xf32, #tpu.memory_space<vmem>>, %arg16: memref<1x128xf32, #tpu.memory_space<vmem>>, %arg17: memref<16x128xf32, #tpu.memory_space<vmem>>, %arg18: memref<2x16x64xf32, #tpu.memory_space<vmem>>) attributes {dimension_semantics = [#tpu.dimension_semantics<parallel>], iteration_bounds = array<i64: 1>, scalar_prefetch = 0 : i64, scratch_operands = 1 : i64, tpu.core_type = #tpu.core_type<tc>, window_params = [{transform_indices = @transform_0, window_bounds = array<i64: 16, 32>}, {transform_indices = @transform_1, window_bounds = array<i64: 16, 16>}, {transform_indices = @transform_2, window_bounds = array<i64: 2, 8, 16>}, {pipeline_mode = #tpu.pipeline_mode<synchronous>, transform_indices = @transform_3, window_bounds = array<i64: 32, 128>}, {pipeline_mode = #tpu.pipeline_mode<synchronous>, transform_indices = @transform_4, window_bounds = array<i64: 1, 128>}, {pipeline_mode = #tpu.pipeline_mode<synchronous>, transform_indices = @transform_5, window_bounds = array<i64: 64, 96>}, {pipeline_mode = #tpu.pipeline_mode<synchronous>, transform_indices = @transform_6, window_bounds = array<i64: 32, 64>}, {pipeline_mode = #tpu.pipeline_mode<synchronous>, transform_indices = @transform_7, window_bounds = array<i64: 32, 32>}, {pipeline_mode = #tpu.pipeline_mode<synchronous>, transform_indices = @transform_8, window_bounds = array<i64: 1, 32>}, {pipeline_mode = #tpu.pipeline_mode<synchronous>, transform_indices = @transform_9, window_bounds = array<i64: 1, 32>}, {pipeline_mode = #tpu.pipeline_mode<synchronous>, transform_indices = @transform_10, window_bounds = array<i64: 1, 32>}, {pipeline_mode = #tpu.pipeline_mode<synchronous>, transform_indices = @transform_11, window_bounds = array<i64: 32, 32>}, {pipeline_mode = #tpu.pipeline_mode<synchronous>, transform_indices = @transform_12, window_bounds = array<i64: 16, 32>}, {pipeline_mode = #tpu.pipeline_mode<synchronous>, transform_indices = @transform_13, window_bounds = array<i64: 1, 32>}, {pipeline_mode = #tpu.pipeline_mode<synchronous>, transform_indices = @transform_14, window_bounds = array<i64: 32, 128>}, {pipeline_mode = #tpu.pipeline_mode<synchronous>, transform_indices = @transform_15, window_bounds = array<i64: 1, 128>}, {transform_indices = @transform_16, window_bounds = array<i64: 16, 128>}]} {
    %c0 = arith.constant 0 : index
    %c0_0 = arith.constant 0 : index
    %0 = vector.load %arg4[%c0, %c0_0] : memref<32x128xf32, #tpu.memory_space<vmem>>, vector<32x128xf32>
    %c0_1 = arith.constant 0 : index
    %c0_2 = arith.constant 0 : index
    %1 = vector.load %arg5[%c0_1, %c0_2] : memref<1x128xf32, #tpu.memory_space<vmem>>, vector<1x128xf32>
    %c0_3 = arith.constant 0 : index
    %c0_4 = arith.constant 0 : index
    %2 = vector.load %arg6[%c0_3, %c0_4] : memref<64x96xf32, #tpu.memory_space<vmem>>, vector<64x96xf32>
    %c0_5 = arith.constant 0 : index
    %c0_6 = arith.constant 0 : index
    %3 = vector.load %arg7[%c0_5, %c0_6] : memref<32x64xf32, #tpu.memory_space<vmem>>, vector<32x64xf32>
    %c0_7 = arith.constant 0 : index
    %c0_8 = arith.constant 0 : index
    %4 = vector.load %arg8[%c0_7, %c0_8] : memref<32x32xf32, #tpu.memory_space<vmem>>, vector<32x32xf32>
    %c0_9 = arith.constant 0 : index
    %c0_10 = arith.constant 0 : index
    %5 = vector.load %arg9[%c0_9, %c0_10] : memref<1x32xf32, #tpu.memory_space<vmem>>, vector<1x32xf32>
    %c0_11 = arith.constant 0 : index
    %c0_12 = arith.constant 0 : index
    %6 = vector.load %arg10[%c0_11, %c0_12] : memref<1x32xf32, #tpu.memory_space<vmem>>, vector<1x32xf32>
    %c0_13 = arith.constant 0 : index
    %c0_14 = arith.constant 0 : index
    %7 = vector.load %arg11[%c0_13, %c0_14] : memref<1x32xf32, #tpu.memory_space<vmem>>, vector<1x32xf32>
    %c0_15 = arith.constant 0 : index
    %c0_16 = arith.constant 0 : index
    %c0_17 = arith.constant 0 : index
    %8 = vector.load %arg3[%c0_15, %c0_16, %c0_17] : memref<2x8x16xf32, #tpu.memory_space<vmem>>, vector<2x8x16xf32>
    %c0_18 = arith.constant 0 : index
    %c0_19 = arith.constant 0 : index
    %9 = vector.load %arg1[%c0_18, %c0_19] : memref<16x32xf32, #tpu.memory_space<vmem>>, vector<16x32xf32>
    %cst = arith.constant dense<0.000000e+00> : vector<16x128xf32>
    %10 = tpu.matmul %9, %0, %cst {dimension_numbers = #tpu.dot_dimension_numbers<[1], [0], [0], [1], [0, 0, 1, 1], [], []>} : vector<16x32xf32>, vector<32x128xf32>, vector<16x128xf32> -> vector<16x128xf32>
    %11 = vector.broadcast %1 : vector<1x128xf32> to vector<16x128xf32>
    %12 = arith.addf %10, %11 : vector<16x128xf32>
    %13 = vector.shape_cast %12 : vector<16x128xf32> to vector<2x8x128xf32>
    %14 = vector.extract_strided_slice %13 {offsets = [0, 0, 0], sizes = [2, 8, 64], strides = [1, 1, 1]} : vector<2x8x128xf32> to vector<2x8x64xf32>
    %c0_20 = arith.constant 0 : index
    %c0_21 = arith.constant 0 : index
    %c0_22 = arith.constant 0 : index
    %15 = vector.load %arg18[%c0_20, %c0_21, %c0_22] : memref<2x16x64xf32, #tpu.memory_space<vmem>>, vector<2x8x64xf32>
    tpu.vector_store %arg18[%c0_20, %c0_21, %c0_22], %14 {strides = array<i32>} : memref<2x16x64xf32, #tpu.memory_space<vmem>>, vector<2x8x64xf32>,
    %16 = vector.extract_strided_slice %13 {offsets = [0, 0, 64], sizes = [2, 8, 64], strides = [1, 1, 1]} : vector<2x8x128xf32> to vector<2x8x64xf32>
    %c0_23 = arith.constant 0 : index
    %c8 = arith.constant 8 : index
    %c0_24 = arith.constant 0 : index
    %17 = vector.load %arg18[%c0_23, %c8, %c0_24] : memref<2x16x64xf32, #tpu.memory_space<vmem>>, vector<2x8x64xf32>
    tpu.vector_store %arg18[%c0_23, %c8, %c0_24], %16 {strides = array<i32>} : memref<2x16x64xf32, #tpu.memory_space<vmem>>, vector<2x8x64xf32>,
    %c0_25 = arith.constant 0 : index
    %c0_26 = arith.constant 0 : index
    %c0_27 = arith.constant 0 : index
    %18 = vector.load %arg18[%c0_25, %c0_26, %c0_27] : memref<2x16x64xf32, #tpu.memory_space<vmem>>, vector<2x16x64xf32>
    "tpu.trace_start"() <{level = 10 : i32, message = "bnm,bmk->bnk"}> : () -> ()
    %cst_28 = arith.constant dense<0.000000e+00> : vector<2x8x64xf32>
    %19 = tpu.matmul %8, %18, %cst_28 {dimension_numbers = #tpu.dot_dimension_numbers<[2], [1], [1], [2], [0, 0, 0, 1, 1, 2], [0], [0]>} : vector<2x8x16xf32>, vector<2x16x64xf32>, vector<2x8x64xf32> -> vector<2x8x64xf32>
    "tpu.trace_stop"() : () -> ()
    %20 = vector.shape_cast %19 : vector<2x8x64xf32> to vector<16x64xf32>
    %cst_29 = arith.constant dense<0.000000e+00> : vector<16x96xf32>
    %21 = tpu.matmul %20, %2, %cst_29 {dimension_numbers = #tpu.dot_dimension_numbers<[1], [0], [0], [1], [0, 0, 1, 1], [], []>} : vector<16x64xf32>, vector<64x96xf32>, vector<16x96xf32> -> vector<16x96xf32>
    %cst_30 = arith.constant dense<0.000000e+00> : vector<16x64xf32>
    %22 = tpu.matmul %9, %3, %cst_30 {dimension_numbers = #tpu.dot_dimension_numbers<[1], [0], [0], [1], [0, 0, 1, 1], [], []>} : vector<16x32xf32>, vector<32x64xf32>, vector<16x64xf32> -> vector<16x64xf32>
    %23 = vector.extract_strided_slice %21 {offsets = [0, 0], sizes = [16, 32], strides = [1, 1]} : vector<16x96xf32> to vector<16x32xf32>
    %24 = vector.extract_strided_slice %22 {offsets = [0, 0], sizes = [16, 32], strides = [1, 1]} : vector<16x64xf32> to vector<16x32xf32>
    %25 = arith.addf %23, %24 : vector<16x32xf32>
    %26 = vector.broadcast %5 : vector<1x32xf32> to vector<16x32xf32>
    %27 = arith.addf %25, %26 : vector<16x32xf32>
    %28 = arith.negf %27 : vector<16x32xf32>
    %29 = math.exp %28 : vector<16x32xf32>
    %cst_31 = arith.constant 1.000000e+00 : f32
    %30 = vector.broadcast %cst_31 : f32 to vector<16x32xf32>
    %31 = arith.addf %30, %29 : vector<16x32xf32>
    %32 = arith.divf %30, %31 : vector<16x32xf32>
    %33 = vector.extract_strided_slice %21 {offsets = [0, 32], sizes = [16, 32], strides = [1, 1]} : vector<16x96xf32> to vector<16x32xf32>
    %34 = vector.extract_strided_slice %22 {offsets = [0, 32], sizes = [16, 32], strides = [1, 1]} : vector<16x64xf32> to vector<16x32xf32>
    %35 = arith.addf %33, %34 : vector<16x32xf32>
    %36 = vector.broadcast %6 : vector<1x32xf32> to vector<16x32xf32>
    %37 = arith.addf %35, %36 : vector<16x32xf32>
    %38 = arith.negf %37 : vector<16x32xf32>
    %39 = math.exp %38 : vector<16x32xf32>
    %cst_32 = arith.constant 1.000000e+00 : f32
    %40 = vector.broadcast %cst_32 : f32 to vector<16x32xf32>
    %41 = arith.addf %40, %39 : vector<16x32xf32>
    %42 = arith.divf %40, %41 : vector<16x32xf32>
    %43 = vector.extract_strided_slice %21 {offsets = [0, 64], sizes = [16, 32], strides = [1, 1]} : vector<16x96xf32> to vector<16x32xf32>
    %44 = arith.mulf %32, %9 : vector<16x32xf32>
    %cst_33 = arith.constant dense<0.000000e+00> : vector<16x32xf32>
    %45 = tpu.matmul %44, %4, %cst_33 {dimension_numbers = #tpu.dot_dimension_numbers<[1], [0], [0], [1], [0, 0, 1, 1], [], []>} : vector<16x32xf32>, vector<32x32xf32>, vector<16x32xf32> -> vector<16x32xf32>
    %46 = arith.addf %43, %45 : vector<16x32xf32>
    %47 = vector.broadcast %7 : vector<1x32xf32> to vector<16x32xf32>
    %48 = arith.addf %46, %47 : vector<16x32xf32>
    %49 = math.tanh %48 : vector<16x32xf32>
    %50 = arith.subf %49, %9 : vector<16x32xf32>
    %51 = arith.mulf %42, %50 : vector<16x32xf32>
    %52 = arith.addf %9, %51 : vector<16x32xf32>
    %cst_34 = arith.constant dense<0.000000e+00> : vector<16x128xf32>
    %53 = tpu.matmul %52, %0, %cst_34 {dimension_numbers = #tpu.dot_dimension_numbers<[1], [0], [0], [1], [0, 0, 1, 1], [], []>} : vector<16x32xf32>, vector<32x128xf32>, vector<16x128xf32> -> vector<16x128xf32>
    %54 = vector.broadcast %1 : vector<1x128xf32> to vector<16x128xf32>
    %55 = arith.addf %53, %54 : vector<16x128xf32>
    %56 = vector.shape_cast %55 : vector<16x128xf32> to vector<2x8x128xf32>
    %57 = vector.extract_strided_slice %56 {offsets = [0, 0, 0], sizes = [2, 8, 64], strides = [1, 1, 1]} : vector<2x8x128xf32> to vector<2x8x64xf32>
    %c0_35 = arith.constant 0 : index
    %c0_36 = arith.constant 0 : index
    %c0_37 = arith.constant 0 : index
    %58 = vector.load %arg18[%c0_35, %c0_36, %c0_37] : memref<2x16x64xf32, #tpu.memory_space<vmem>>, vector<2x8x64xf32>
    tpu.vector_store %arg18[%c0_35, %c0_36, %c0_37], %57 {strides = array<i32>} : memref<2x16x64xf32, #tpu.memory_space<vmem>>, vector<2x8x64xf32>,
    %59 = vector.extract_strided_slice %56 {offsets = [0, 0, 64], sizes = [2, 8, 64], strides = [1, 1, 1]} : vector<2x8x128xf32> to vector<2x8x64xf32>
    %c0_38 = arith.constant 0 : index
    %c8_39 = arith.constant 8 : index
    %c0_40 = arith.constant 0 : index
    %60 = vector.load %arg18[%c0_38, %c8_39, %c0_40] : memref<2x16x64xf32, #tpu.memory_space<vmem>>, vector<2x8x64xf32>
    tpu.vector_store %arg18[%c0_38, %c8_39, %c0_40], %59 {strides = array<i32>} : memref<2x16x64xf32, #tpu.memory_space<vmem>>, vector<2x8x64xf32>,
    %c0_41 = arith.constant 0 : index
    %c0_42 = arith.constant 0 : index
    %c0_43 = arith.constant 0 : index
    %61 = vector.load %arg18[%c0_41, %c0_42, %c0_43] : memref<2x16x64xf32, #tpu.memory_space<vmem>>, vector<2x16x64xf32>
    "tpu.trace_start"() <{level = 10 : i32, message = "bnm,bmk->bnk"}> : () -> ()
    %cst_44 = arith.constant dense<0.000000e+00> : vector<2x8x64xf32>
    %62 = tpu.matmul %8, %61, %cst_44 {dimension_numbers = #tpu.dot_dimension_numbers<[2], [1], [1], [2], [0, 0, 0, 1, 1, 2], [0], [0]>} : vector<2x8x16xf32>, vector<2x16x64xf32>, vector<2x8x64xf32> -> vector<2x8x64xf32>
    "tpu.trace_stop"() : () -> ()
    %63 = vector.shape_cast %62 : vector<2x8x64xf32> to vector<16x64xf32>
    %cst_45 = arith.constant dense<0.000000e+00> : vector<16x96xf32>
    %64 = tpu.matmul %63, %2, %cst_45 {dimension_numbers = #tpu.dot_dimension_numbers<[1], [0], [0], [1], [0, 0, 1, 1], [], []>} : vector<16x64xf32>, vector<64x96xf32>, vector<16x96xf32> -> vector<16x96xf32>
    %cst_46 = arith.constant dense<0.000000e+00> : vector<16x64xf32>
    %65 = tpu.matmul %52, %3, %cst_46 {dimension_numbers = #tpu.dot_dimension_numbers<[1], [0], [0], [1], [0, 0, 1, 1], [], []>} : vector<16x32xf32>, vector<32x64xf32>, vector<16x64xf32> -> vector<16x64xf32>
    %66 = vector.extract_strided_slice %64 {offsets = [0, 0], sizes = [16, 32], strides = [1, 1]} : vector<16x96xf32> to vector<16x32xf32>
    %67 = vector.extract_strided_slice %65 {offsets = [0, 0], sizes = [16, 32], strides = [1, 1]} : vector<16x64xf32> to vector<16x32xf32>
    %68 = arith.addf %66, %67 : vector<16x32xf32>
    %69 = vector.broadcast %5 : vector<1x32xf32> to vector<16x32xf32>
    %70 = arith.addf %68, %69 : vector<16x32xf32>
    %71 = arith.negf %70 : vector<16x32xf32>
    %72 = math.exp %71 : vector<16x32xf32>
    %cst_47 = arith.constant 1.000000e+00 : f32
    %73 = vector.broadcast %cst_47 : f32 to vector<16x32xf32>
    %74 = arith.addf %73, %72 : vector<16x32xf32>
    %75 = arith.divf %73, %74 : vector<16x32xf32>
    %76 = vector.extract_strided_slice %64 {offsets = [0, 32], sizes = [16, 32], strides = [1, 1]} : vector<16x96xf32> to vector<16x32xf32>
    %77 = vector.extract_strided_slice %65 {offsets = [0, 32], sizes = [16, 32], strides = [1, 1]} : vector<16x64xf32> to vector<16x32xf32>
    %78 = arith.addf %76, %77 : vector<16x32xf32>
    %79 = vector.broadcast %6 : vector<1x32xf32> to vector<16x32xf32>
    %80 = arith.addf %78, %79 : vector<16x32xf32>
    %81 = arith.negf %80 : vector<16x32xf32>
    %82 = math.exp %81 : vector<16x32xf32>
    %cst_48 = arith.constant 1.000000e+00 : f32
    %83 = vector.broadcast %cst_48 : f32 to vector<16x32xf32>
    %84 = arith.addf %83, %82 : vector<16x32xf32>
    %85 = arith.divf %83, %84 : vector<16x32xf32>
    %86 = vector.extract_strided_slice %64 {offsets = [0, 64], sizes = [16, 32], strides = [1, 1]} : vector<16x96xf32> to vector<16x32xf32>
    %87 = arith.mulf %75, %52 : vector<16x32xf32>
    %cst_49 = arith.constant dense<0.000000e+00> : vector<16x32xf32>
    %88 = tpu.matmul %87, %4, %cst_49 {dimension_numbers = #tpu.dot_dimension_numbers<[1], [0], [0], [1], [0, 0, 1, 1], [], []>} : vector<16x32xf32>, vector<32x32xf32>, vector<16x32xf32> -> vector<16x32xf32>
    %89 = arith.addf %86, %88 : vector<16x32xf32>
    %90 = vector.broadcast %7 : vector<1x32xf32> to vector<16x32xf32>
    %91 = arith.addf %89, %90 : vector<16x32xf32>
    %92 = math.tanh %91 : vector<16x32xf32>
    %93 = arith.subf %92, %52 : vector<16x32xf32>
    %94 = arith.mulf %85, %93 : vector<16x32xf32>
    %95 = arith.addf %52, %94 : vector<16x32xf32>
    %cst_50 = arith.constant dense<0.000000e+00> : vector<16x128xf32>
    %96 = tpu.matmul %95, %0, %cst_50 {dimension_numbers = #tpu.dot_dimension_numbers<[1], [0], [0], [1], [0, 0, 1, 1], [], []>} : vector<16x32xf32>, vector<32x128xf32>, vector<16x128xf32> -> vector<16x128xf32>
    %97 = vector.broadcast %1 : vector<1x128xf32> to vector<16x128xf32>
    %98 = arith.addf %96, %97 : vector<16x128xf32>
    %99 = vector.shape_cast %98 : vector<16x128xf32> to vector<2x8x128xf32>
    %100 = vector.extract_strided_slice %99 {offsets = [0, 0, 0], sizes = [2, 8, 64], strides = [1, 1, 1]} : vector<2x8x128xf32> to vector<2x8x64xf32>
    %c0_51 = arith.constant 0 : index
    %c0_52 = arith.constant 0 : index
    %c0_53 = arith.constant 0 : index
    %101 = vector.load %arg18[%c0_51, %c0_52, %c0_53] : memref<2x16x64xf32, #tpu.memory_space<vmem>>, vector<2x8x64xf32>
    tpu.vector_store %arg18[%c0_51, %c0_52, %c0_53], %100 {strides = array<i32>} : memref<2x16x64xf32, #tpu.memory_space<vmem>>, vector<2x8x64xf32>,
    %102 = vector.extract_strided_slice %99 {offsets = [0, 0, 64], sizes = [2, 8, 64], strides = [1, 1, 1]} : vector<2x8x128xf32> to vector<2x8x64xf32>
    %c0_54 = arith.constant 0 : index
    %c8_55 = arith.constant 8 : index
    %c0_56 = arith.constant 0 : index
    %103 = vector.load %arg18[%c0_54, %c8_55, %c0_56] : memref<2x16x64xf32, #tpu.memory_space<vmem>>, vector<2x8x64xf32>
    tpu.vector_store %arg18[%c0_54, %c8_55, %c0_56], %102 {strides = array<i32>} : memref<2x16x64xf32, #tpu.memory_space<vmem>>, vector<2x8x64xf32>,
    %c0_57 = arith.constant 0 : index
    %c0_58 = arith.constant 0 : index
    %c0_59 = arith.constant 0 : index
    %104 = vector.load %arg18[%c0_57, %c0_58, %c0_59] : memref<2x16x64xf32, #tpu.memory_space<vmem>>, vector<2x16x64xf32>
    "tpu.trace_start"() <{level = 10 : i32, message = "bnm,bmk->bnk"}> : () -> ()
    %cst_60 = arith.constant dense<0.000000e+00> : vector<2x8x64xf32>
    %105 = tpu.matmul %8, %104, %cst_60 {dimension_numbers = #tpu.dot_dimension_numbers<[2], [1], [1], [2], [0, 0, 0, 1, 1, 2], [0], [0]>} : vector<2x8x16xf32>, vector<2x16x64xf32>, vector<2x8x64xf32> -> vector<2x8x64xf32>
    "tpu.trace_stop"() : () -> ()
    %106 = vector.shape_cast %105 : vector<2x8x64xf32> to vector<16x64xf32>
    %cst_61 = arith.constant dense<0.000000e+00> : vector<16x96xf32>
    %107 = tpu.matmul %106, %2, %cst_61 {dimension_numbers = #tpu.dot_dimension_numbers<[1], [0], [0], [1], [0, 0, 1, 1], [], []>} : vector<16x64xf32>, vector<64x96xf32>, vector<16x96xf32> -> vector<16x96xf32>
    %cst_62 = arith.constant dense<0.000000e+00> : vector<16x64xf32>
    %108 = tpu.matmul %95, %3, %cst_62 {dimension_numbers = #tpu.dot_dimension_numbers<[1], [0], [0], [1], [0, 0, 1, 1], [], []>} : vector<16x32xf32>, vector<32x64xf32>, vector<16x64xf32> -> vector<16x64xf32>
    %109 = vector.extract_strided_slice %107 {offsets = [0, 0], sizes = [16, 32], strides = [1, 1]} : vector<16x96xf32> to vector<16x32xf32>
    %110 = vector.extract_strided_slice %108 {offsets = [0, 0], sizes = [16, 32], strides = [1, 1]} : vector<16x64xf32> to vector<16x32xf32>
    %111 = arith.addf %109, %110 : vector<16x32xf32>
    %112 = vector.broadcast %5 : vector<1x32xf32> to vector<16x32xf32>
    %113 = arith.addf %111, %112 : vector<16x32xf32>
    %114 = arith.negf %113 : vector<16x32xf32>
    %115 = math.exp %114 : vector<16x32xf32>
    %cst_63 = arith.constant 1.000000e+00 : f32
    %116 = vector.broadcast %cst_63 : f32 to vector<16x32xf32>
    %117 = arith.addf %116, %115 : vector<16x32xf32>
    %118 = arith.divf %116, %117 : vector<16x32xf32>
    %119 = vector.extract_strided_slice %107 {offsets = [0, 32], sizes = [16, 32], strides = [1, 1]} : vector<16x96xf32> to vector<16x32xf32>
    %120 = vector.extract_strided_slice %108 {offsets = [0, 32], sizes = [16, 32], strides = [1, 1]} : vector<16x64xf32> to vector<16x32xf32>
    %121 = arith.addf %119, %120 : vector<16x32xf32>
    %122 = vector.broadcast %6 : vector<1x32xf32> to vector<16x32xf32>
    %123 = arith.addf %121, %122 : vector<16x32xf32>
    %124 = arith.negf %123 : vector<16x32xf32>
    %125 = math.exp %124 : vector<16x32xf32>
    %cst_64 = arith.constant 1.000000e+00 : f32
    %126 = vector.broadcast %cst_64 : f32 to vector<16x32xf32>
    %127 = arith.addf %126, %125 : vector<16x32xf32>
    %128 = arith.divf %126, %127 : vector<16x32xf32>
    %129 = vector.extract_strided_slice %107 {offsets = [0, 64], sizes = [16, 32], strides = [1, 1]} : vector<16x96xf32> to vector<16x32xf32>
    %130 = arith.mulf %118, %95 : vector<16x32xf32>
    %cst_65 = arith.constant dense<0.000000e+00> : vector<16x32xf32>
    %131 = tpu.matmul %130, %4, %cst_65 {dimension_numbers = #tpu.dot_dimension_numbers<[1], [0], [0], [1], [0, 0, 1, 1], [], []>} : vector<16x32xf32>, vector<32x32xf32>, vector<16x32xf32> -> vector<16x32xf32>
    %132 = arith.addf %129, %131 : vector<16x32xf32>
    %133 = vector.broadcast %7 : vector<1x32xf32> to vector<16x32xf32>
    %134 = arith.addf %132, %133 : vector<16x32xf32>
    %135 = math.tanh %134 : vector<16x32xf32>
    %136 = arith.subf %135, %95 : vector<16x32xf32>
    %137 = arith.mulf %128, %136 : vector<16x32xf32>
    %138 = arith.addf %95, %137 : vector<16x32xf32>
    %c0_66 = arith.constant 0 : index
    %c0_67 = arith.constant 0 : index
    %139 = vector.load %arg12[%c0_66, %c0_67] : memref<32x32xf32, #tpu.memory_space<vmem>>, vector<32x32xf32>
    %cst_68 = arith.constant dense<0.000000e+00> : vector<16x32xf32>
    %140 = tpu.matmul %138, %139, %cst_68 {dimension_numbers = #tpu.dot_dimension_numbers<[1], [0], [0], [1], [0, 0, 1, 1], [], []>} : vector<16x32xf32>, vector<32x32xf32>, vector<16x32xf32> -> vector<16x32xf32>
    %c0_69 = arith.constant 0 : index
    %c0_70 = arith.constant 0 : index
    %141 = vector.load %arg2[%c0_69, %c0_70] : memref<16x16xf32, #tpu.memory_space<vmem>>, vector<16x16xf32>
    %c0_71 = arith.constant 0 : index
    %c0_72 = arith.constant 0 : index
    %142 = vector.load %arg13[%c0_71, %c0_72] : memref<16x32xf32, #tpu.memory_space<vmem>>, vector<16x32xf32>
    %cst_73 = arith.constant dense<0.000000e+00> : vector<16x32xf32>
    %143 = tpu.matmul %141, %142, %cst_73 {dimension_numbers = #tpu.dot_dimension_numbers<[1], [0], [0], [1], [0, 0, 1, 1], [], []>} : vector<16x16xf32>, vector<16x32xf32>, vector<16x32xf32> -> vector<16x32xf32>
    %144 = arith.addf %140, %143 : vector<16x32xf32>
    %c0_74 = arith.constant 0 : index
    %c0_75 = arith.constant 0 : index
    %145 = vector.load %arg14[%c0_74, %c0_75] : memref<1x32xf32, #tpu.memory_space<vmem>>, vector<1x32xf32>
    %146 = vector.broadcast %145 : vector<1x32xf32> to vector<16x32xf32>
    %147 = arith.addf %144, %146 : vector<16x32xf32>
    %148 = math.tanh %147 : vector<16x32xf32>
    %c0_76 = arith.constant 0 : index
    %c0_77 = arith.constant 0 : index
    %149 = vector.load %arg15[%c0_76, %c0_77] : memref<32x128xf32, #tpu.memory_space<vmem>>, vector<32x128xf32>
    %cst_78 = arith.constant dense<0.000000e+00> : vector<16x128xf32>
    %150 = tpu.matmul %148, %149, %cst_78 {dimension_numbers = #tpu.dot_dimension_numbers<[1], [0], [0], [1], [0, 0, 1, 1], [], []>} : vector<16x32xf32>, vector<32x128xf32>, vector<16x128xf32> -> vector<16x128xf32>
    %c0_79 = arith.constant 0 : index
    %c0_80 = arith.constant 0 : index
    %151 = vector.load %arg16[%c0_79, %c0_80] : memref<1x128xf32, #tpu.memory_space<vmem>>, vector<1x128xf32>
    %152 = vector.broadcast %151 : vector<1x128xf32> to vector<16x128xf32>
    %153 = arith.addf %150, %152 : vector<16x128xf32>
    %c0_81 = arith.constant 0 : index
    %c0_82 = arith.constant 0 : index
    %154 = vector.load %arg17[%c0_81, %c0_82] : memref<16x128xf32, #tpu.memory_space<vmem>>, vector<16x128xf32>
    tpu.vector_store %arg17[%c0_81, %c0_82], %153 {strides = array<i32>} : memref<16x128xf32, #tpu.memory_space<vmem>>, vector<16x128xf32>,
    return
  }
  func.func @transform_0(%arg0: i32) -> (i32, i32) {
    %c0_i32 = arith.constant 0 : i32
    %c0_i32_0 = arith.constant 0 : i32
    return %arg0, %c0_i32 : i32, i32
  }
  func.func @transform_1(%arg0: i32) -> (i32, i32) {
    %c0_i32 = arith.constant 0 : i32
    %c0_i32_0 = arith.constant 0 : i32
    return %arg0, %c0_i32 : i32, i32
  }
  func.func @transform_2(%arg0: i32) -> (i32, i32, i32) {
    %c0_i32 = arith.constant 0 : i32
    %c0_i32_0 = arith.constant 0 : i32
    %c0_i32_1 = arith.constant 0 : i32
    return %arg0, %c0_i32, %c0_i32_0 : i32, i32, i32
  }
  func.func @transform_3(%arg0: i32) -> (i32, i32) {
    %c0_i32 = arith.constant 0 : i32
    %c0_i32_0 = arith.constant 0 : i32
    %c0_i32_1 = arith.constant 0 : i32
    return %c0_i32, %c0_i32_0 : i32, i32
  }
  func.func @transform_4(%arg0: i32) -> (i32, i32) {
    %c0_i32 = arith.constant 0 : i32
    %c0_i32_0 = arith.constant 0 : i32
    %c0_i32_1 = arith.constant 0 : i32
    return %c0_i32, %c0_i32_0 : i32, i32
  }
  func.func @transform_5(%arg0: i32) -> (i32, i32) {
    %c0_i32 = arith.constant 0 : i32
    %c0_i32_0 = arith.constant 0 : i32
    %c0_i32_1 = arith.constant 0 : i32
    return %c0_i32, %c0_i32_0 : i32, i32
  }
  func.func @transform_6(%arg0: i32) -> (i32, i32) {
    %c0_i32 = arith.constant 0 : i32
    %c0_i32_0 = arith.constant 0 : i32
    %c0_i32_1 = arith.constant 0 : i32
    return %c0_i32, %c0_i32_0 : i32, i32
  }
  func.func @transform_7(%arg0: i32) -> (i32, i32) {
    %c0_i32 = arith.constant 0 : i32
    %c0_i32_0 = arith.constant 0 : i32
    %c0_i32_1 = arith.constant 0 : i32
    return %c0_i32, %c0_i32_0 : i32, i32
  }
  func.func @transform_8(%arg0: i32) -> (i32, i32) {
    %c0_i32 = arith.constant 0 : i32
    %c0_i32_0 = arith.constant 0 : i32
    %c0_i32_1 = arith.constant 0 : i32
    return %c0_i32, %c0_i32_0 : i32, i32
  }
  func.func @transform_9(%arg0: i32) -> (i32, i32) {
    %c0_i32 = arith.constant 0 : i32
    %c0_i32_0 = arith.constant 0 : i32
    %c0_i32_1 = arith.constant 0 : i32
    return %c0_i32, %c0_i32_0 : i32, i32
  }
  func.func @transform_10(%arg0: i32) -> (i32, i32) {
    %c0_i32 = arith.constant 0 : i32
    %c0_i32_0 = arith.constant 0 : i32
    %c0_i32_1 = arith.constant 0 : i32
    return %c0_i32, %c0_i32_0 : i32, i32
  }
  func.func @transform_11(%arg0: i32) -> (i32, i32) {
    %c0_i32 = arith.constant 0 : i32
    %c0_i32_0 = arith.constant 0 : i32
    %c0_i32_1 = arith.constant 0 : i32
    return %c0_i32, %c0_i32_0 : i32, i32
  }
  func.func @transform_12(%arg0: i32) -> (i32, i32) {
    %c0_i32 = arith.constant 0 : i32
    %c0_i32_0 = arith.constant 0 : i32
    %c0_i32_1 = arith.constant 0 : i32
    return %c0_i32, %c0_i32_0 : i32, i32
  }
  func.func @transform_13(%arg0: i32) -> (i32, i32) {
    %c0_i32 = arith.constant 0 : i32
    %c0_i32_0 = arith.constant 0 : i32
    %c0_i32_1 = arith.constant 0 : i32
    return %c0_i32, %c0_i32_0 : i32, i32
  }
  func.func @transform_14(%arg0: i32) -> (i32, i32) {
    %c0_i32 = arith.constant 0 : i32
    %c0_i32_0 = arith.constant 0 : i32
    %c0_i32_1 = arith.constant 0 : i32
    return %c0_i32, %c0_i32_0 : i32, i32
  }
  func.func @transform_15(%arg0: i32) -> (i32, i32) {
    %c0_i32 = arith.constant 0 : i32
    %c0_i32_0 = arith.constant 0 : i32
    %c0_i32_1 = arith.constant 0 : i32
    return %c0_i32, %c0_i32_0 : i32, i32
  }
  func.func @transform_16(%arg0: i32) -> (i32, i32) {
    %c0_i32 = arith.constant 0 : i32
    %c0_i32_0 = arith.constant 0 : i32
    return %arg0, %c0_i32 : i32, i32
  }
}

</mosaic_0001>

<bundles_post_ra>
// kernel: tpu_custom_call.1
= control target key start
LH: loop header
LB: loop body
LE: loop exit
PB: predicated region body
PF: predicated region fallthrough
CT: control target
= control target key end

     0   :  { %s3626_s0 = inlined_call_operand.hbm [shape: f32[16,32], index: 0, kind: input, shape index: {}]   ;;  %s3627_s1 = inlined_call_operand.hbm [shape: f32[16,16], index: 1, kind: input, shape index: {}]   ;;  %s3628_s2 = inlined_call_operand.hbm [shape: f32[2,8,16], index: 2, kind: input, shape index: {}]   ;;  %s3629_s3 = inlined_call_operand.hbm [shape: f32[32,128], index: 3, kind: input, shape index: {}]   ;;  %s3630_s4 = inlined_call_operand.vmem [shape: f32[1,128], index: 4, kind: input, shape index: {}]   ;;  %s3631_s5 = inlined_call_operand.hbm [shape: f32[64,96], index: 5, kind: input, shape index: {}]   ;;  %s3632_s6 = inlined_call_operand.hbm [shape: f32[32,64], index: 6, kind: input, shape index: {}]   ;;  %s3633_s7 = inlined_call_operand.hbm [shape: f32[32,32], index: 7, kind: input, shape index: {}]   ;;  %s3634_s8 = inlined_call_operand.vmem [shape: f32[1,32], index: 8, kind: input, shape index: {}]   ;;  %s3635_s9 = inlined_call_operand.vmem [shape: f32[1,32], index: 9, kind: input, shape index: {}]   ;;  %s3636_s10 = inlined_call_operand.vmem [shape: f32[1,32], index: 10, kind: input, shape index: {}]   ;;  %s3637_s11 = inlined_call_operand.vmem [shape: f32[32,32], index: 11, kind: input, shape index: {}]   ;;  %s3638_s12 = inlined_call_operand.hbm [shape: f32[16,32], index: 12, kind: input, shape index: {}]   ;;  %s3639_s13 = inlined_call_operand.vmem [shape: f32[1,32], index: 13, kind: input, shape index: {}]   ;;  %s3640_s14 = inlined_call_operand.hbm [shape: f32[32,128], index: 14, kind: input, shape index: {}]   ;;  %s3641_s15 = inlined_call_operand.vmem [shape: f32[1,128], index: 15, kind: input, shape index: {}]   ;;  %s3642_s16 = inlined_call_operand.hbm [shape: f32[16,128], index: 16, kind: output, shape index: {}]  }
   0x1   :  { %3644 = sst [smem:[#allocation25_spill]] %s3626_s0 }
   0x2   :  { %21 = vsyncpa [#allocation4], 0 }
   0x3   :  { %22 = vsyncpa [#allocation7], 0 }
   0x4   :  { %23 = vsyncpa [#allocation10], 0 }
   0x5   :  { %24 = vsyncpa [#allocation13], 0 }
   0x6   :  { %25 = vsyncpa [#allocation16], 0 }
   0x7   :  { %26 = vsyncpa [#allocation5], 0  ;;  %s3054_s21 = smov [#allocation6]   ;;  %s3055_s23 = smov [#allocation9]  }
   0x8   :  { %s44_s22 = sshll.u32 %s3054_s21, 4  ;;  %s68_s24 = sshll.u32 %s3055_s23, 4  ;;  %s45_s22 = int_to_ptr.vmem [resolvable:$true] %s44_s22  ;;  %s3157_s24 = int_to_ptr.vmem [resolvable:$true] %s68_s24 }
   0x9   :  { %s2822_s27 = scalar_lea.hbm %s3627_s1, 256 }
   0xa   :  { %p2823_p0 = scmp.ne.s32.totalorder %s3627_s1, %s2822_s27  ;;  %p2826_p1 = scmp.lt.u32.totalorder %s2822_s27, %s3627_s1 }
   0xc   :  { %p2828_p2 = pnand %p2826_p1, %p2823_p0 }
   0xe   :  { %2831 = shalt.err (!%p2828_p2)
}
   0xf   :  { %s2832_s17 = scalar_lea.vmem %s45_s22, 256  ;;  %p2837_p4 = scmp.lt.s32.totalorder %s45_s22, %s45_s22 }
  0x10   :  { %p2833_p3 = scmp.ne.s32.totalorder %s45_s22, %s2832_s17  ;;  %p2838_p5 = scmp.lt.s32.totalorder %s2832_s17, %s2832_s17 }
  0x12   :  { %p2839_p6 = por %p2838_p5, %p2837_p4 }
  0x14   :  { %p2840_p7 = pnand %p2839_p6, %p2833_p3 }
  0x16   :  { %2843 = shalt.err (!%p2840_p7)
}
  0x17   :  { %s3056_s18 = smov 128   ;;  %s3057_s19 = smov 8  }
  0x18   :  { %50 = dma.hbm_to_vmem [thread:$0]  %s3627_s1, 256, %s45_s22, [#allocation7], %s3056_s18, %s3056_s18, %s3057_s19  }
  0x19   :  { %s2844_s26 = scalar_lea.hbm %s3629_s3, 512 }
  0x1a   :  { %p2845_p8 = scmp.ne.s32.totalorder %s3629_s3, %s2844_s26  ;;  %p2848_p9 = scmp.lt.u32.totalorder %s2844_s26, %s3629_s3 }
  0x1c   :  { %p2850_p10 = pnand %p2848_p9, %p2845_p8 }
  0x1e   :  { %2853 = shalt.err (!%p2850_p10)
}
  0x1f   :  { %s2854_s0 = scalar_lea.vmem %s3157_s24, 512  ;;  %p2859_p12 = scmp.lt.s32.totalorder %s3157_s24, %s3157_s24 }
  0x20   :  { %p2855_p11 = scmp.ne.s32.totalorder %s3157_s24, %s2854_s0  ;;  %p2860_p13 = scmp.lt.s32.totalorder %s2854_s0, %s2854_s0 }
  0x22   :  { %p2861_p0 = por %p2860_p13, %p2859_p12 }
  0x24   :  { %p2862_p1 = pnand %p2861_p0, %p2855_p11 }
  0x26   :  { %2865 = shalt.err (!%p2862_p1)
}
  0x27   :  { %74 = dma.hbm_to_vmem [thread:$0]  %s3629_s3, 512, %s3157_s24, [#allocation10], %s3056_s18, %s3056_s18, %s3057_s19  }
  0x28   :  { %s3058_s17 = smov [#allocation12]   ;;  %s3059_s21 = smov [#allocation15]  }
  0x29   :  { %s94_s20 = sshll.u32 %s3058_s17, 4  ;;  %s126_s23 = sshll.u32 %s3059_s21, 4  ;;  %s95_s20 = int_to_ptr.vmem [resolvable:$true] %s94_s20  ;;  %s3194_s23 = int_to_ptr.vmem [resolvable:$true] %s126_s23 }
  0x2a   :  { %s2866_s27 = scalar_lea.hbm %s3632_s6, 512 }
  0x2b   :  { %p2867_p2 = scmp.ne.s32.totalorder %s3632_s6, %s2866_s27  ;;  %p2870_p3 = scmp.lt.u32.totalorder %s2866_s27, %s3632_s6 }
  0x2d   :  { %p2872_p4 = pnand %p2870_p3, %p2867_p2 }
  0x2f   :  { %2875 = shalt.err (!%p2872_p4)
}
  0x30   :  { %s2876_s3 = scalar_lea.vmem %s95_s20, 512  ;;  %p2881_p6 = scmp.lt.s32.totalorder %s95_s20, %s95_s20 }
  0x31   :  { %p2877_p5 = scmp.ne.s32.totalorder %s95_s20, %s2876_s3  ;;  %p2882_p7 = scmp.lt.s32.totalorder %s2876_s3, %s2876_s3 }
  0x33   :  { %p2883_p8 = por %p2882_p7, %p2881_p6 }
  0x35   :  { %p2884_p9 = pnand %p2883_p8, %p2877_p5 }
  0x37   :  { %2887 = shalt.err (!%p2884_p9)
}
  0x38   :  { %100 = dma.hbm_to_vmem [thread:$0]  %s3632_s6, 512, %s95_s20, [#allocation13], %s3056_s18, %s3056_s18, %s3057_s19  }
  0x39   :  { %s2888_s21 = scalar_lea.hbm %s3638_s12, 256 }
  0x3a   :  { %p2889_p10 = scmp.ne.s32.totalorder %s3638_s12, %s2888_s21  ;;  %p2892_p11 = scmp.lt.u32.totalorder %s2888_s21, %s3638_s12 }
  0x3c   :  { %p2894_p12 = pnand %p2892_p11, %p2889_p10 }
  0x3e   :  { %2897 = shalt.err (!%p2894_p12)
}
  0x3f   :  { %s2898_s29 = scalar_lea.vmem %s3194_s23, 256  ;;  %p2903_p0 = scmp.lt.s32.totalorder %s3194_s23, %s3194_s23 }
  0x40   :  { %p2899_p13 = scmp.ne.s32.totalorder %s3194_s23, %s2898_s29  ;;  %p2904_p1 = scmp.lt.s32.totalorder %s2898_s29, %s2898_s29 }
  0x42   :  { %p2905_p2 = por %p2904_p1, %p2903_p0 }
  0x44   :  { %p2906_p3 = pnand %p2905_p2, %p2899_p13 }
  0x46   :  { %2909 = shalt.err (!%p2906_p3)
}
  0x47   :  { %132 = dma.hbm_to_vmem [thread:$0]  %s3638_s12, 256, %s3194_s23, [#allocation16], %s3056_s18, %s3056_s18, %s3057_s19  }
  0x48   :  { %s3060_s30 = smov [#allocation3]   ;;  %s3061_s3 = smov [#allocation8]  }
  0x49   :  { %s32_s0 = sshll.u32 %s3060_s30, 4  ;;  %s56_s24 = sshll.u32 %s3061_s3, 4  ;;  %s33_s0 = int_to_ptr.vmem [resolvable:$true] %s32_s0  ;;  %s3231_s24 = int_to_ptr.vmem [resolvable:$true] %s56_s24 }
  0x4a   :  { %s3645_s17 = sld [smem:[#allocation25_spill]] }
  0x50   :  { %s2910_s21 = scalar_lea.hbm %s3645_s17, 256 }
  0x51   :  { %p2911_p4 = scmp.ne.s32.totalorder %s3645_s17, %s2910_s21  ;;  %p2914_p5 = scmp.lt.u32.totalorder %s2910_s21, %s3645_s17 }
  0x53   :  { %p2916_p6 = pnand %p2914_p5, %p2911_p4 }
  0x55   :  { %2919 = shalt.err (!%p2916_p6)
}
  0x56   :  { %s2920_s12 = scalar_lea.vmem %s33_s0, 256  ;;  %p2925_p8 = scmp.lt.s32.totalorder %s33_s0, %s33_s0 }
  0x57   :  { %p2921_p7 = scmp.ne.s32.totalorder %s33_s0, %s2920_s12  ;;  %p2926_p9 = scmp.lt.s32.totalorder %s2920_s12, %s2920_s12 }
  0x59   :  { %p2927_p10 = por %p2926_p9, %p2925_p8 }
  0x5b   :  { %p2928_p11 = pnand %p2927_p10, %p2921_p7 }
  0x5d   :  { %2931 = shalt.err (!%p2928_p11)
}
  0x5e   :  { %38 = dma.hbm_to_vmem [thread:$0]  %s3645_s17, 256, %s33_s0, [#allocation4], %s3056_s18, %s3056_s18, %s3057_s19  }
  0x5f   :  { %s2932_s30 = scalar_lea.hbm %s3628_s2, 256 }
  0x60   :  { %p2933_p12 = scmp.ne.s32.totalorder %s3628_s2, %s2932_s30  ;;  %p2936_p13 = scmp.lt.u32.totalorder %s2932_s30, %s3628_s2 }
  0x62   :  { %p2938_p0 = pnand %p2936_p13, %p2933_p12 }
  0x64   :  { %2941 = shalt.err (!%p2938_p0)
}
  0x65   :  { %s2942_s25 = scalar_lea.vmem %s3231_s24, 256  ;;  %p2947_p2 = scmp.lt.s32.totalorder %s3231_s24, %s3231_s24 }
  0x66   :  { %p2943_p1 = scmp.ne.s32.totalorder %s3231_s24, %s2942_s25  ;;  %p2948_p3 = scmp.lt.s32.totalorder %s2942_s25, %s2942_s25 }
  0x68   :  { %p2949_p4 = por %p2948_p3, %p2947_p2 }
  0x6a   :  { %p2950_p5 = pnand %p2949_p4, %p2943_p1 }
  0x6c   :  { %2953 = shalt.err (!%p2950_p5)
}
  0x6d   :  { %62 = dma.hbm_to_vmem [thread:$0]  %s3628_s2, 256, %s3231_s24, [#allocation7], %s3056_s18, %s3056_s18, %s3057_s19  }
  0x6e   :  { %s3062_s26 = smov [#allocation11]   ;;  %s3063_s28 = smov [#allocation14]  }
  0x6f   :  { %s82_s27 = sshll.u32 %s3062_s26, 4  ;;  %s106_s12 = sshll.u32 %s3063_s28, 4  ;;  %s83_s27 = int_to_ptr.vmem [resolvable:$true] %s82_s27  ;;  %s3268_s12 = int_to_ptr.vmem [resolvable:$true] %s106_s12 }
  0x70   :  { %s2954_s6 = scalar_lea.hbm %s3631_s5, 1024 }
  0x71   :  { %p2955_p6 = scmp.ne.s32.totalorder %s3631_s5, %s2954_s6  ;;  %p2958_p7 = scmp.lt.u32.totalorder %s2954_s6, %s3631_s5 }
  0x73   :  { %p2960_p8 = pnand %p2958_p7, %p2955_p6 }
  0x75   :  { %2963 = shalt.err (!%p2960_p8)
}
  0x76   :  { %s2964_s2 = scalar_lea.vmem %s83_s27, 1024  ;;  %p2969_p10 = scmp.lt.s32.totalorder %s83_s27, %s83_s27 }
  0x77   :  { %p2965_p9 = scmp.ne.s32.totalorder %s83_s27, %s2964_s2  ;;  %p2970_p11 = scmp.lt.s32.totalorder %s2964_s2, %s2964_s2 }
  0x79   :  { %p2971_p12 = por %p2970_p11, %p2969_p10 }
  0x7b   :  { %p2972_p13 = pnand %p2971_p12, %p2965_p9 }
  0x7d   :  { %2975 = shalt.err (!%p2972_p13)
}
  0x7e   :  { %88 = dma.hbm_to_vmem [thread:$0]  %s3631_s5, 1024, %s83_s27, [#allocation10], %s3056_s18, %s3056_s18, %s3057_s19  }
  0x7f   :  { %s2976_s0 = scalar_lea.hbm %s3633_s7, 512 }
  0x80   :  { %p2977_p0 = scmp.ne.s32.totalorder %s3633_s7, %s2976_s0  ;;  %p2980_p1 = scmp.lt.u32.totalorder %s2976_s0, %s3633_s7 }
  0x82   :  { %p2982_p2 = pnand %p2980_p1, %p2977_p0 }
  0x84   :  { %2985 = shalt.err (!%p2982_p2)
}
  0x85   :  { %s2986_s29 = scalar_lea.vmem %s3268_s12, 512  ;;  %p2991_p4 = scmp.lt.s32.totalorder %s3268_s12, %s3268_s12 }
  0x86   :  { %p2987_p3 = scmp.ne.s32.totalorder %s3268_s12, %s2986_s29  ;;  %p2992_p5 = scmp.lt.s32.totalorder %s2986_s29, %s2986_s29 }
  0x88   :  { %p2993_p6 = por %p2992_p5, %p2991_p4 }
  0x8a   :  { %p2994_p7 = pnand %p2993_p6, %p2987_p3 }
  0x8c   :  { %2997 = shalt.err (!%p2994_p7)
}
  0x8d   :  { %112 = dma.hbm_to_vmem [thread:$0]  %s3633_s7, 512, %s3268_s12, [#allocation13], %s3056_s18, %s3056_s18, %s3057_s19  }
  0x8e   :  { %s3064_s6 = smov [#allocation17]   ;;  %s2998_s1 = scalar_lea.hbm %s3640_s14, 512 }
  0x8f   :  { %s140_s20 = sshll.u32 %s3064_s6, 4  ;;  %p2999_p8 = scmp.ne.s32.totalorder %s3640_s14, %s2998_s1  ;;  %s141_s20 = int_to_ptr.vmem [resolvable:$true] %s140_s20 }
  0x90   :  { %p3002_p9 = scmp.lt.u32.totalorder %s2998_s1, %s3640_s14 }
  0x92   :  { %p3004_p10 = pnand %p3002_p9, %p2999_p8 }
  0x94   :  { %3007 = shalt.err (!%p3004_p10)
}
  0x95   :  { %s3008_s25 = scalar_lea.vmem %s141_s20, 512  ;;  %p3013_p12 = scmp.lt.s32.totalorder %s141_s20, %s141_s20 }
  0x96   :  { %p3009_p11 = scmp.ne.s32.totalorder %s141_s20, %s3008_s25  ;;  %p3014_p13 = scmp.lt.s32.totalorder %s3008_s25, %s3008_s25 }
  0x98   :  { %p3015_p0 = por %p3014_p13, %p3013_p12 }
  0x9a   :  { %p3016_p1 = pnand %p3015_p0, %p3009_p11 }
  0x9c   :  { %3019 = shalt.err (!%p3016_p1)
}
  0x9d   :  { %146 = dma.hbm_to_vmem [thread:$0]  %s3640_s14, 512, %s141_s20, [#allocation16], %s3056_s18, %s3056_s18, %s3057_s19  }
  0x9e   :  { %3042 = dma.done.wait [#allocation4], 256  }
  0x9f   :  { %3043 = vsyncadd [#allocation4], 4294967040 }
  0xa0   :  { %3044 = dma.done.wait [#allocation7], 512  }
  0xa1   :  { %3045 = vsyncadd [#allocation7], 4294966784 }
  0xa2   :  { %3046 = dma.done.wait [#allocation10], 1536  }
  0xa3   :  { %3047 = vsyncadd [#allocation10], 4294965760 }
  0xa4   :  { %3048 = dma.done.wait [#allocation13], 1024  }
  0xa5   :  { %3049 = vsyncadd [#allocation13], 4294966272 }
  0xa6   :  { %3050 = dma.done.wait [#allocation16], 768  }
  0xa7   :  { %3051 = vsyncadd [#allocation16], 4294966528  ;;  %vm210_vm0 = vcmask 261120   ;;  %v176_v0 = vld [vmem:[#allocation9] sm:$0xff]  ;;  %v177_v1 = vld [vmem:[#allocation9 + $0x8] sm:$0xff]  ;;  %v3065_v8 = vmov 0.0|0.0  }
  0xa8   :  { %v178_v2 = vld [vmem:[#allocation9 + $0x10] sm:$0xff]  ;;  %v3320_v3 = vpack.c.bf16 %v177_v1, %v176_v0  ;;  %v179_v4 = vld [vmem:[#allocation9 + $0x18] sm:$0xff]  ;;  %2588 = vmatprep.subr.bf16.mxu1 %v3065_v8  ;;  %vm292_vm1 = vcmask 523264   ;;  %vm3066_vm2 = vmmov 0   ;;  %v3067_v14 = vmov 0.0   ;;  %s3068_s17 = smov 64  }
  0xa9   :  { %v3322_v5 = vld [vmem:[#allocation3] sm:$0xff]  ;;  %v3324_v6 = vpack.c.bf16 %v179_v4, %v178_v2  ;;  %v3332_v7 = vld [vmem:[#allocation3 + $0x8] sm:$0xff]  ;;  %2368 = vmatprep.mubr.msk.f32.mxu1 %vm3066_vm2, %v3067_v14  ;;  %v181_v15 = vld [vmem:[#allocation11] sm:$0xff]  ;;  %vm309_vm3 = vcmask 130048   ;;  %s3069_s5 = smov 32   ;;  %s3071_s25 = smov [#allocation18]  }
  0xaa   :  { %2361 = vmatprep.mubr.msk.f32.mxu0 %vm210_vm0, %v3322_v5  ;;  %2581 = vmatprep.subr.bf16.mxu0 %v3320_v3  ;;  %v3340_v9 = vld [vmem:[%s3630_s4] ss:$0 sm:$0xff]  ;;  %v182_v16 = vld [vmem:[#allocation11 + $0x8] sm:$0xff]  ;;  %v184_v19 = vld [vmem:[#allocation11 + $0x18] sm:$0xff]  ;;  %s2165_s7 = sshll.u32 %s3071_s25, 4  ;;  %s2166_s7 = int_to_ptr.vmem [resolvable:$true] %s2165_s7 }
  0xab   :  { %2583 = vmatpush3.bf16.msra.mxu0 %v3320_v3  ;;  %v183_v17 = vld [vmem:[#allocation11 + $0x10] sm:$0xff]  ;;  %v3350_v18 = vpack.c.bf16 %v182_v16, %v181_v15  ;;  %v185_v21 = vld [vmem:[#allocation11 + $0x20] sm:$0xff]  ;;  %v186_v22 = vld [vmem:[#allocation11 + $0x28] sm:$0xff]  ;;  %p3025_p3 = scmp.lt.s32.totalorder %s2166_s7, %s2166_s7 }
  0xac   :  { %2585 = vmatprep.subr.bf16.mxu0 %v3324_v6  ;;  %v3352_v20 = vpack.c.bf16 %v184_v19, %v183_v17  ;;  %v3357_v23 = vpack.c.bf16 %v186_v22, %v185_v21  ;;  %v189_v29 = vld [vmem:[#allocation12] sm:$0xff]  ;;  %v190_v30 = vld [vmem:[#allocation12 + $0x8] sm:$0xff]  ;;  %v3364_v31 = vld [vmem:[#allocation8] sm:$0xff] }
  0xad   :  { %v3367_v34 = vpack.c.bf16 %v190_v30, %v189_v29  ;;  %v3373_v36 = vld [vmem:[#allocation8 + $0x8] sm:$0xff]  ;;  %v191_v37 = vld [vmem:[#allocation12 + $0x10] sm:$0xff]  ;;  %v193_v49 = vld [vmem:[#allocation14] sm:$0xff] }
  0xae   :  { %v192_v38 = vld [vmem:[#allocation12 + $0x18] sm:$0xff]  ;;  %v187_v40 = vld [vmem:[#allocation11 + $0x30] sm:$0xff]  ;;  %v194_v50 = vld [vmem:[#allocation14 + $0x8] sm:$0xff] }
  0xaf   :  { %2587 = vmatpush3.bf16.msra.mxu0 %v3324_v6  ;;  %v3381_v39 = vpack.c.bf16 %v192_v38, %v191_v37  ;;  %v188_v41 = vld [vmem:[#allocation11 + $0x38] sm:$0xff]  ;;  %v195_v51 = vld [vmem:[#allocation14 + $0x10] sm:$0xff]  ;;  %v3398_v52 = vpack.c.bf16 %v194_v50, %v193_v49 }
  0xb0   :  { %2595 = vmatprep.subr.bf16.mxu0 %v3350_v18  ;;  %v3383_v42 = vpack.c.bf16 %v188_v41, %v187_v40  ;;  %v196_v53 = vld [vmem:[#allocation14 + $0x18] sm:$0xff]  ;;  %v3410_v55 = vld [vmem:[%s3634_s8] ss:$0 sm:$0xff] }
  0xb1   :  { %v3400_v54 = vpack.c.bf16 %v196_v53, %v195_v51  ;;  %v2198_v15 = vld [vmem:[%s3636_s10] ss:$0 sm:$0xff]  ;;  %s3070_s10 = smov 96  }
  0xb2   :  { %2362 = vmatmul.mubr.msk.f32.vlgmr.msra.gmra.mrb[0].mxu0 %vm210_vm0, %v3332_v7  ;;  %v2193_v19 = vld [vmem:[%s3635_s9] ss:$0 sm:$0xff] }
  0xb3   :  { %2597 = vmatpush3.bf16.msra.mxu0 %v3350_v18 }
  0xb4   :  { %2599 = vmatprep.subr.bf16.mxu0 %v3352_v20 }
  0xb7   :  { %2601 = vmatpush3.bf16.msra.mxu0 %v3352_v20 }
  0xb8   :  { %2603 = vmatprep.subr.bf16.mxu0 %v3357_v23 }
  0xbb   :  { %2605 = vmatpush3.bf16.msra.mxu0 %v3357_v23 }
  0xbc   :  { %2607 = vmatprep.subr.bf16.mxu0 %v3383_v42 }
  0xbf   :  { %2609 = vmatpush3.bf16.msra.mxu0 %v3383_v42 }
  0xc0   :  { %2627 = vmatprep.subr.bf16.mxu0 %v3320_v3 }
 0x185   :  { %v2363_v10 = vpop.f32.mrb[0].mxu0 }
 0x186   :  { %v289_v11 = vadd.f32 %v2363_v10, %v3340_v9  ;;  %v283_v12 = vpop.f32.mrb[1].mxu0 }
 0x187   :  { %v284_v13 = vadd.f32 %v3340_v9, %v283_v12 }
 0x188   :  { %294 = vst.msk [vmem:[#allocation2 + $0x10] sm:$0xff] %vm292_vm1, %v289_v11 }
 0x189   :  { %293 = vst.msk [vmem:[#allocation2] sm:$0xff] %vm292_vm1, %v284_v13  ;;  %297 = vrot.lane.b32.xlu0 %v284_v13, %s3068_s17 }
 0x18d   :  { %299 = vrot.lane.b32.xlu0 %v289_v11, %s3068_s17 }
 0x18f   :  { %v307_v32 = vld [vmem:[#allocation2 + $0x10] sm:$0xff] }
 0x190   :  { %v305_v26 = vld [vmem:[#allocation2] sm:$0xff] }
 0x191   :  { %754 = vrot.lane.b32.xlu0 %v2198_v15, %s3068_s17 }
 0x195   :  { %763 = vrot.lane.b32.xlu0 %v3332_v7, %s3068_s17 }
 0x1fb   :  { %v298_v24 = vpop.permute.xlu0 %297 }
 0x1fc   :  { %303 = vst.msk [vmem:[#allocation2 + $0x8] sm:$0xff] %vm292_vm1, %v298_v24 }
 0x1ff   :  { %v300_v25 = vpop.permute.xlu0 %299 }
 0x200   :  { %304 = vst.msk [vmem:[#allocation2 + $0x18] sm:$0xff] %vm292_vm1, %v300_v25 }
 0x203   :  { %v306_v27 = vld [vmem:[#allocation2 + $0x8] sm:$0xff]  ;;  %v3433_v22 = vpop.permute.xlu0 %754 }
 0x204   :  { %v2589_v28 = vpack.c.bf16 %v306_v27, %v305_v26 }
 0x206   :  { %2590 = vmatpush3.bf16.msra.mxu1 %v2589_v28 }
 0x207   :  { %2591 = vmatprep.subr.bf16.mxu1 %v3065_v8  ;;  %v308_v33 = vld [vmem:[#allocation2 + $0x18] sm:$0xff] }
 0x208   :  { %v2592_v35 = vpack.c.bf16 %v308_v33, %v307_v32  ;;  %v764_v33 = vpop.permute.xlu0 %763 }
 0x209   :  { %2369 = vmatmul.mubr.msk.f32.vlgmr.msra.gmra.mrb[0].mxu1 %vm309_vm3, %v3364_v31 }
 0x20a   :  { %2593 = vmatpush3.bf16.msra.mxu1 %v2592_v35  ;;  %2375 = vmatprep.mubr.msk.f32.mxu1 %vm3066_vm2, %v3067_v14 }
 0x20b   :  { %2611 = vmatprep.subr.bf16.mxu1 %v3367_v34 }
 0x20d   :  { %2376 = vmatmul.mubr.msk.f32.vlgmr.msra.gmra.mrb[2].mxu1 %vm309_vm3, %v3373_v36 }
 0x20e   :  { %2613 = vmatpush3.bf16.msra.mxu1 %v3367_v34  ;;  %2405 = vmatprep.mubr.msk.f32.mxu1 %vm210_vm0, %v3322_v5 }
 0x20f   :  { %2615 = vmatprep.subr.bf16.mxu1 %v3381_v39 }
 0x212   :  { %2617 = vmatpush3.bf16.msra.mxu1 %v3381_v39 }
 0x213   :  { %2619 = vmatprep.subr.bf16.mxu1 %v3398_v52 }
 0x215   :  { %2406 = vmatmul.mubr.msk.f32.vlgmr.msra.gmra.mrb[4].mxu1 %vm210_vm0, %v3332_v7 }
 0x216   :  { %2621 = vmatpush3.bf16.msra.mxu1 %v3398_v52 }
 0x217   :  { %2623 = vmatprep.subr.bf16.mxu1 %v3400_v54 }
 0x21a   :  { %2625 = vmatpush3.bf16.msra.mxu1 %v3400_v54 }
 0x21b   :  { %2634 = vmatprep.subr.bf16.mxu1 %v3065_v8 }
 0x2dc   :  { %v379_v43 = vpop.f32.mrb[0].mxu1 }
 0x2dd   :  { %v2370_v44 = vpop.f32.mrb[1].mxu1  ;;  %2394 = vmatprep.mubr.msk.f32.mxu0 %vm292_vm1, %v379_v43 }
 0x2e0   :  { %v452_v45 = vpop.f32.mrb[2].mxu1 }
 0x2e1   :  { %v2377_v46 = vpop.f32.mrb[3].mxu1  ;;  %2395 = vmatmul.mubr.msk.f32.vlgmr.msra.gmra.mrb[2].mxu0 %vm292_vm1, %v452_v45 }
 0x2e2   :  { %2629 = vmatpush3.bf16.msra.mxu0 %v3320_v3 }
 0x2e3   :  { %2631 = vmatprep.subr.bf16.mxu0 %v3324_v6 }
 0x2e6   :  { %2633 = vmatpush3.bf16.msra.mxu0 %v3324_v6 }
 0x2e7   :  { %2641 = vmatprep.subr.bf16.mxu0 %v3350_v18 }
 0x2e8   :  { %v2407_v47 = vpop.f32.mrb[4].mxu1 }
 0x2e9   :  { %v603_v48 = vpop.f32.mrb[5].mxu1 }
 0x3b4   :  { %v2396_v56 = vpop.f32.mrb[2].mxu0 }
 0x3b5   :  { %v613_v57 = vadd.f32 %v2407_v47, %v2396_v56  ;;  %v528_v58 = vpop.f32.mrb[3].mxu0 }
 0x3b6   :  { %v612_v59 = vadd.f32 %v603_v48, %v528_v58 }
 0x3b7   :  { %v621_v60 = vadd.f32 %v3410_v55, %v613_v57 }
 0x3b8   :  { %v620_v61 = vadd.f32 %v3410_v55, %v612_v59 }
 0x3b9   :  { %v2192_v62 = vmul.f32 -1.442695, %v621_v60 }
 0x3ba   :  { %v2191_v63 = vmul.f32 -1.442695, %v620_v61 }
 0x3bb   :  { %2758 = vpow2.f32 %v2192_v62 }
 0x3bc   :  { %2760 = vpow2.f32 %v2191_v63 }
 0x3c5   :  { %v2759_v0 = vpop.eup %2758 }
 0x3c6   :  { %v2761_v1 = vpop.eup %2760  ;;  %v629_v2 = vadd.f32 1.0, %v2759_v0 }
 0x3c7   :  { %v628_v4 = vadd.f32 1.0, %v2761_v1 }
 0x3c8   :  { %2762 = vrcp.f32 %v629_v2 }
 0x3c9   :  { %2764 = vrcp.f32 %v628_v4 }
 0x3d2   :  { %v2763_v10 = vpop.eup %2762 }
 0x3d3   :  { %v2765_v11 = vpop.eup %2764  ;;  %v657_v13 = vmul.f32 %v2763_v10, %v3332_v7 }
 0x3d4   :  { %v656_v12 = vmul.f32 %v2765_v11, %v3322_v5 }
 0x3d6   :  { %2416 = vmatprep.mubr.msk.f32.mxu1 %vm210_vm0, %v656_v12 }
 0x3d7   :  { %2417 = vmatmul.mubr.msk.f32.vlgmr.msra.gmra.mrb[6].mxu1 %vm210_vm0, %v657_v13 }
 0x3d8   :  { %2434 = vmatprep.mubr.msk.f32.mxu1 %vm3066_vm2, %v3067_v14 }
 0x4aa   :  { %v2418_v16 = vpop.f32.mrb[6].mxu1 }
 0x4ab   :  { %v730_v17 = vpop.f32.mrb[7].mxu1 }
 0x4ac   :  { %741 = vrot.lane.b32.xlu1 %v730_v17, %s3068_s17 }
 0x4b0   :  { %743 = vrot.lane.b32.xlu1 %v2418_v16, %s3068_s17 }
 0x4b4   :  { %761 = vrot.lane.b32.xlu1 %v3322_v5, %s3068_s17 }
 0x4b8   :  { %639 = vrot.lane.b32.xlu1 %v2193_v19, %s3069_s5 }
 0x51e   :  { %v742_v21 = vpop.permute.xlu1 %741 }
 0x51f   :  { %v747_v24 = vadd.f32 %v742_v21, %v528_v58 }
 0x521   :  { %v757_v25 = vadd.f32 %v3433_v22, %v747_v24 }
 0x522   :  { %v744_v26 = vpop.permute.xlu1 %743 }
 0x523   :  { %v748_v27 = vadd.f32 %v2396_v56, %v744_v26  ;;  %2766 = vtanh.f32 %v757_v25 }
 0x525   :  { %v758_v28 = vadd.f32 %v3433_v22, %v748_v27 }
 0x526   :  { %v762_v30 = vpop.permute.xlu1 %761 }
 0x527   :  { %2768 = vtanh.f32 %v758_v28 }
 0x52a   :  { %v3439_v38 = vpop.permute.xlu1 %639 }
 0x52b   :  { %v642_v40 = vadd.f32 %v3439_v38, %v612_v59  ;;  %v643_v41 = vadd.f32 %v3439_v38, %v613_v57 }
 0x52d   :  { %v2767_v29 = vpop.eup %2766  ;;  %v2194_v43 = vmul.f32 -1.442695, %v642_v40  ;;  %v2195_v44 = vmul.f32 -1.442695, %v643_v41 }
 0x52e   :  { %v767_v32 = vsub.f32 %v2767_v29, %v762_v30 }
 0x52f   :  { %2770 = vpow2.f32 %v2194_v43 }
 0x530   :  { %771 = vrot.lane.b32.xlu0 %v767_v32, %s3070_s10  ;;  %2772 = vpow2.f32 %v2195_v44 }
 0x531   :  { %v2769_v35 = vpop.eup %2768 }
 0x532   :  { %v768_v37 = vsub.f32 %v2769_v35, %v764_v33 }
 0x534   :  { %773 = vrot.lane.b32.xlu1 %v768_v37, %s3070_s10 }
 0x539   :  { %v2771_v45 = vpop.eup %2770 }
 0x53a   :  { %v650_v46 = vadd.f32 1.0, %v2771_v45  ;;  %v2773_v47 = vpop.eup %2772 }
 0x53b   :  { %v651_v48 = vadd.f32 1.0, %v2773_v47 }
 0x53c   :  { %2774 = vrcp.f32 %v650_v46 }
 0x53d   :  { %2776 = vrcp.f32 %v651_v48 }
 0x546   :  { %v2775_v49 = vpop.eup %2774 }
 0x547   :  { %v2777_v53 = vpop.eup %2776 }
 0x5a2   :  { %v772_v50 = vpop.permute.xlu0 %771 }
 0x5a3   :  { %v777_v51 = vmul.f32 %v2775_v49, %v772_v50 }
 0x5a5   :  { %781 = vrot.lane.b32.xlu0 %v777_v51, %s3070_s10 }
 0x5a6   :  { %v774_v56 = vpop.permute.xlu1 %773 }
 0x5a7   :  { %v778_v58 = vmul.f32 %v2777_v53, %v774_v56 }
 0x5a9   :  { %783 = vrot.lane.b32.xlu1 %v778_v58, %s3070_s10 }
 0x617   :  { %v782_v57 = vpop.permute.xlu0 %781 }
 0x618   :  { %v3446_v59 = vadd.f32 %v782_v57, %v3322_v5 }
 0x61a   :  { %2427 = vmatprep.mubr.msk.f32.mxu0 %vm210_vm0, %v3446_v59 }
 0x61b   :  { %v784_v60 = vpop.permute.xlu1 %783 }
 0x61c   :  { %v3451_v61 = vadd.f32 %v784_v60, %v3332_v7 }
 0x61e   :  { %2428 = vmatmul.mubr.msk.f32.vlgmr.msra.gmra.mrb[4].mxu0 %vm210_vm0, %v3451_v61 }
 0x61f   :  { %2643 = vmatpush3.bf16.msra.mxu0 %v3350_v18 }
 0x620   :  { %2645 = vmatprep.subr.bf16.mxu0 %v3352_v20 }
 0x623   :  { %2647 = vmatpush3.bf16.msra.mxu0 %v3352_v20 }
 0x624   :  { %2649 = vmatprep.subr.bf16.mxu0 %v3357_v23 }
 0x627   :  { %2651 = vmatpush3.bf16.msra.mxu0 %v3357_v23 }
 0x628   :  { %2653 = vmatprep.subr.bf16.mxu0 %v3383_v42 }
 0x62b   :  { %2655 = vmatpush3.bf16.msra.mxu0 %v3383_v42 }
 0x62c   :  { %2673 = vmatprep.subr.bf16.mxu0 %v3320_v3 }
 0x6f1   :  { %v2429_v5 = vpop.f32.mrb[4].mxu0 }
 0x6f2   :  { %v867_v7 = vadd.f32 %v2429_v5, %v3340_v9  ;;  %v861_v62 = vpop.f32.mrb[5].mxu0 }
 0x6f3   :  { %v862_v63 = vadd.f32 %v3340_v9, %v861_v62 }
 0x6f4   :  { %871 = vst.msk [vmem:[#allocation2 + $0x10] sm:$0xff] %vm292_vm1, %v867_v7  ;;  %876 = vrot.lane.b32.xlu1 %v867_v7, %s3068_s17 }
 0x6f5   :  { %870 = vst.msk [vmem:[#allocation2] sm:$0xff] %vm292_vm1, %v862_v63  ;;  %874 = vrot.lane.b32.xlu0 %v862_v63, %s3068_s17 }
 0x6fb   :  { %v884_v12 = vld [vmem:[#allocation2 + $0x10] sm:$0xff] }
 0x6fc   :  { %v882_v2 = vld [vmem:[#allocation2] sm:$0xff] }
 0x766   :  { %v877_v0 = vpop.permute.xlu1 %876 }
 0x767   :  { %881 = vst.msk [vmem:[#allocation2 + $0x18] sm:$0xff] %vm292_vm1, %v877_v0  ;;  %v875_v1 = vpop.permute.xlu0 %874 }
 0x768   :  { %880 = vst.msk [vmem:[#allocation2 + $0x8] sm:$0xff] %vm292_vm1, %v875_v1 }
 0x76e   :  { %v885_v11 = vld [vmem:[#allocation2 + $0x18] sm:$0xff] }
 0x76f   :  { %v883_v4 = vld [vmem:[#allocation2 + $0x8] sm:$0xff]  ;;  %v2638_v13 = vpack.c.bf16 %v885_v11, %v884_v12 }
 0x770   :  { %v2635_v10 = vpack.c.bf16 %v883_v4, %v882_v2 }
 0x772   :  { %2636 = vmatpush3.bf16.msra.mxu1 %v2635_v10 }
 0x773   :  { %2637 = vmatprep.subr.bf16.mxu1 %v3065_v8 }
 0x775   :  { %2435 = vmatmul.mubr.msk.f32.vlgmr.msra.gmra.mrb[8].mxu1 %vm309_vm3, %v3364_v31 }
 0x776   :  { %2639 = vmatpush3.bf16.msra.mxu1 %v2638_v13  ;;  %2441 = vmatprep.mubr.msk.f32.mxu1 %vm3066_vm2, %v3067_v14 }
 0x777   :  { %2657 = vmatprep.subr.bf16.mxu1 %v3367_v34 }
 0x779   :  { %2442 = vmatmul.mubr.msk.f32.vlgmr.msra.gmra.mrb[10].mxu1 %vm309_vm3, %v3373_v36 }
 0x77a   :  { %2659 = vmatpush3.bf16.msra.mxu1 %v3367_v34  ;;  %2471 = vmatprep.mubr.msk.f32.mxu1 %vm210_vm0, %v3446_v59 }
 0x77b   :  { %2661 = vmatprep.subr.bf16.mxu1 %v3381_v39 }
 0x77e   :  { %2663 = vmatpush3.bf16.msra.mxu1 %v3381_v39 }
 0x77f   :  { %2665 = vmatprep.subr.bf16.mxu1 %v3398_v52 }
 0x781   :  { %2472 = vmatmul.mubr.msk.f32.vlgmr.msra.gmra.mrb[12].mxu1 %vm210_vm0, %v3451_v61 }
 0x782   :  { %2667 = vmatpush3.bf16.msra.mxu1 %v3398_v52 }
 0x783   :  { %2669 = vmatprep.subr.bf16.mxu1 %v3400_v54 }
 0x786   :  { %2671 = vmatpush3.bf16.msra.mxu1 %v3400_v54 }
 0x787   :  { %2680 = vmatprep.subr.bf16.mxu1 %v3065_v8 }
 0x848   :  { %v952_v15 = vpop.f32.mrb[8].mxu1 }
 0x849   :  { %v2436_v16 = vpop.f32.mrb[9].mxu1  ;;  %2460 = vmatprep.mubr.msk.f32.mxu0 %vm292_vm1, %v952_v15 }
 0x84c   :  { %v1022_v17 = vpop.f32.mrb[10].mxu1 }
 0x84d   :  { %v2443_v19 = vpop.f32.mrb[11].mxu1  ;;  %2461 = vmatmul.mubr.msk.f32.vlgmr.msra.gmra.mrb[6].mxu0 %vm292_vm1, %v1022_v17 }
 0x84e   :  { %2675 = vmatpush3.bf16.msra.mxu0 %v3320_v3 }
 0x84f   :  { %2677 = vmatprep.subr.bf16.mxu0 %v3324_v6 }
 0x852   :  { %2679 = vmatpush3.bf16.msra.mxu0 %v3324_v6 }
 0x853   :  { %2687 = vmatprep.subr.bf16.mxu0 %v3350_v18 }
 0x854   :  { %v2473_v21 = vpop.f32.mrb[12].mxu1 }
 0x855   :  { %v1173_v24 = vpop.f32.mrb[13].mxu1 }
 0x920   :  { %v2462_v25 = vpop.f32.mrb[6].mxu0 }
 0x921   :  { %v1183_v26 = vadd.f32 %v2473_v21, %v2462_v25  ;;  %v1098_v27 = vpop.f32.mrb[7].mxu0 }
 0x922   :  { %v1182_v28 = vadd.f32 %v1173_v24, %v1098_v27 }
 0x923   :  { %v1185_v29 = vadd.f32 %v3410_v55, %v1183_v26  ;;  %v1199_v62 = vadd.f32 %v1183_v26, %v3439_v38 }
 0x924   :  { %v1184_v30 = vadd.f32 %v3410_v55, %v1182_v28  ;;  %v1198_v63 = vadd.f32 %v1182_v28, %v3439_v38 }
 0x925   :  { %v2208_v32 = vmul.f32 -1.442695, %v1185_v29  ;;  %v2210_v0 = vmul.f32 -1.442695, %v1199_v62  ;;  %v1889_v62 = vld [vmem:[#allocation6] sm:$0xff] }
 0x926   :  { %v2207_v33 = vmul.f32 -1.442695, %v1184_v30  ;;  %v2209_v1 = vmul.f32 -1.442695, %v1198_v63 }
 0x927   :  { %2778 = vpow2.f32 %v2208_v32 }
 0x928   :  { %2780 = vpow2.f32 %v2207_v33 }
 0x931   :  { %v2779_v3 = vpop.eup %2778 }
 0x932   :  { %v1193_v35 = vadd.f32 1.0, %v2779_v3  ;;  %v2781_v37 = vpop.eup %2780 }
 0x933   :  { %v1192_v6 = vadd.f32 1.0, %v2781_v37 }
 0x934   :  { %2782 = vrcp.f32 %v1193_v35 }
 0x935   :  { %2784 = vrcp.f32 %v1192_v6 }
 0x93e   :  { %v2783_v40 = vpop.eup %2782 }
 0x93f   :  { %v2785_v41 = vpop.eup %2784  ;;  %v1213_v44 = vmul.f32 %v2783_v40, %v3451_v61 }
 0x940   :  { %v1212_v43 = vmul.f32 %v2785_v41, %v3446_v59 }
 0x942   :  { %2482 = vmatprep.mubr.msk.f32.mxu1 %vm210_vm0, %v1212_v43 }
 0x943   :  { %2483 = vmatmul.mubr.msk.f32.vlgmr.msra.gmra.mrb[14].mxu1 %vm210_vm0, %v1213_v44 }
 0x944   :  { %2500 = vmatprep.mubr.msk.f32.mxu1 %vm3066_vm2, %v3067_v14 }
 0xa16   :  { %v2484_v45 = vpop.f32.mrb[14].mxu1 }
 0xa17   :  { %1299 = vrot.lane.b32.xlu1 %v2484_v45, %s3068_s17  ;;  %v1286_v46 = vpop.f32.mrb[15].mxu1 }
 0xa18   :  { %1297 = vrot.lane.b32.xlu0 %v1286_v46, %s3068_s17 }
 0xa1b   :  { %1311 = vrot.lane.b32.xlu1 %v3451_v61, %s3068_s17 }
 0xa1c   :  { %1309 = vrot.lane.b32.xlu0 %v3446_v59, %s3068_s17 }
 0xa89   :  { %v1300_v47 = vpop.permute.xlu1 %1299 }
 0xa8a   :  { %v1304_v48 = vadd.f32 %v2462_v25, %v1300_v47  ;;  %v1298_v49 = vpop.permute.xlu0 %1297 }
 0xa8b   :  { %v1303_v50 = vadd.f32 %v1298_v49, %v1098_v27 }
 0xa8c   :  { %v1306_v51 = vadd.f32 %v1304_v48, %v3433_v22 }
 0xa8d   :  { %v1305_v53 = vadd.f32 %v1303_v50, %v3433_v22  ;;  %v1312_v58 = vpop.permute.xlu1 %1311 }
 0xa8e   :  { %2786 = vtanh.f32 %v1306_v51  ;;  %v1310_v5 = vpop.permute.xlu0 %1309 }
 0xa8f   :  { %2788 = vtanh.f32 %v1305_v53 }
 0xa90   :  { %2790 = vpow2.f32 %v2210_v0  ;;  %v1885_v0 = vld [vmem:[%s3637_s11] sm:$0xff] }
 0xa91   :  { %2792 = vpow2.f32 %v2209_v1  ;;  %v1886_v1 = vld [vmem:[%s3637_s11 + $0x8] sm:$0xff] }
 0xa98   :  { %v2787_v56 = vpop.eup %2786 }
 0xa99   :  { %v2789_v57 = vpop.eup %2788  ;;  %v1316_v60 = vsub.f32 %v2787_v56, %v1312_v58 }
 0xa9a   :  { %v1315_v7 = vsub.f32 %v2789_v57, %v1310_v5  ;;  %v2791_v2 = vpop.eup %2790  ;;  %v1891_v5 = vld [vmem:[#allocation15] sm:$0xff] }
 0xa9b   :  { %1321 = vrot.lane.b32.xlu1 %v1316_v60, %s3070_s10  ;;  %v2793_v4 = vpop.eup %2792  ;;  %v1207_v10 = vadd.f32 1.0, %v2791_v2  ;;  %v2722_v2 = vpack.c.bf16 %v1886_v1, %v1885_v0 }
 0xa9c   :  { %1319 = vrot.lane.b32.xlu0 %v1315_v7, %s3070_s10  ;;  %v1206_v11 = vadd.f32 1.0, %v2793_v4  ;;  %v1892_v7 = vld [vmem:[#allocation15 + $0x8] sm:$0xff] }
 0xa9d   :  { %2794 = vrcp.f32 %v1207_v10  ;;  %v2718_v63 = vpack.c.bf16 %v1892_v7, %v1891_v5 }
 0xa9e   :  { %2796 = vrcp.f32 %v1206_v11 }
 0xaa7   :  { %v2795_v12 = vpop.eup %2794 }
 0xaa8   :  { %v2797_v15 = vpop.eup %2796 }
 0xb0d   :  { %v1322_v13 = vpop.permute.xlu1 %1321 }
 0xb0e   :  { %v1326_v16 = vmul.f32 %v2795_v12, %v1322_v13  ;;  %v1320_v17 = vpop.permute.xlu0 %1319 }
 0xb0f   :  { %v1325_v19 = vmul.f32 %v2797_v15, %v1320_v17 }
 0xb10   :  { %1331 = vrot.lane.b32.xlu1 %v1326_v16, %s3070_s10 }
 0xb11   :  { %1329 = vrot.lane.b32.xlu0 %v1325_v19, %s3070_s10 }
 0xb82   :  { %v1332_v21 = vpop.permute.xlu1 %1331 }
 0xb83   :  { %v1330_v24 = vpop.permute.xlu0 %1329  ;;  %v3523_v26 = vadd.f32 %v1332_v21, %v3451_v61 }
 0xb84   :  { %v3520_v25 = vadd.f32 %v1330_v24, %v3446_v59 }
 0xb86   :  { %2493 = vmatprep.mubr.msk.f32.mxu0 %vm210_vm0, %v3520_v25 }
 0xb87   :  { %2494 = vmatmul.mubr.msk.f32.vlgmr.msra.gmra.mrb[8].mxu0 %vm210_vm0, %v3523_v26 }
 0xb88   :  { %2689 = vmatpush3.bf16.msra.mxu0 %v3350_v18 }
 0xb89   :  { %2691 = vmatprep.subr.bf16.mxu0 %v3352_v20 }
 0xb8c   :  { %2693 = vmatpush3.bf16.msra.mxu0 %v3352_v20 }
 0xb8d   :  { %2695 = vmatprep.subr.bf16.mxu0 %v3357_v23 }
 0xb90   :  { %2697 = vmatpush3.bf16.msra.mxu0 %v3357_v23 }
 0xb91   :  { %2699 = vmatprep.subr.bf16.mxu0 %v3383_v42 }
 0xb94   :  { %2701 = vmatpush3.bf16.msra.mxu0 %v3383_v42 }
 0xb95   :  { %2719 = vmatprep.subr.bf16.mxu0 %v2718_v63 }
 0xc5a   :  { %v2495_v59 = vpop.f32.mrb[8].mxu0 }
 0xc5b   :  { %v1415_v61 = vadd.f32 %v2495_v59, %v3340_v9  ;;  %v1409_v27 = vpop.f32.mrb[9].mxu0 }
 0xc5c   :  { %v1410_v28 = vadd.f32 %v3340_v9, %v1409_v27 }
 0xc5d   :  { %1419 = vst.msk [vmem:[#allocation2 + $0x10] sm:$0xff] %vm292_vm1, %v1415_v61  ;;  %1424 = vrot.lane.b32.xlu1 %v1415_v61, %s3068_s17 }
 0xc5e   :  { %1418 = vst.msk [vmem:[#allocation2] sm:$0xff] %vm292_vm1, %v1410_v28  ;;  %1422 = vrot.lane.b32.xlu0 %v1410_v28, %s3068_s17  ;;  %v1887_v28 = vld [vmem:[%s3637_s11 + $0x10] sm:$0xff] }
 0xc64   :  { %v1432_v9 = vld [vmem:[#allocation2 + $0x10] sm:$0xff] }
 0xc65   :  { %v1430_v23 = vld [vmem:[#allocation2] sm:$0xff] }
 0xccf   :  { %v1425_v18 = vpop.permute.xlu1 %1424 }
 0xcd0   :  { %1429 = vst.msk [vmem:[#allocation2 + $0x18] sm:$0xff] %vm292_vm1, %v1425_v18  ;;  %v1423_v20 = vpop.permute.xlu0 %1422  ;;  %v1888_v18 = vld [vmem:[%s3637_s11 + $0x18] sm:$0xff] }
 0xcd1   :  { %1428 = vst.msk [vmem:[#allocation2 + $0x8] sm:$0xff] %vm292_vm1, %v1423_v20  ;;  %v2726_v20 = vpack.c.bf16 %v1888_v18, %v1887_v28 }
 0xcd7   :  { %v1433_v30 = vld [vmem:[#allocation2 + $0x18] sm:$0xff] }
 0xcd8   :  { %v1431_v42 = vld [vmem:[#allocation2 + $0x8] sm:$0xff]  ;;  %v2684_v32 = vpack.c.bf16 %v1433_v30, %v1432_v9 }
 0xcd9   :  { %v2681_v29 = vpack.c.bf16 %v1431_v42, %v1430_v23 }
 0xcdb   :  { %2682 = vmatpush3.bf16.msra.mxu1 %v2681_v29 }
 0xcdc   :  { %2683 = vmatprep.subr.bf16.mxu1 %v3065_v8 }
 0xcde   :  { %2501 = vmatmul.mubr.msk.f32.vlgmr.msra.gmra.mrb[16].mxu1 %vm309_vm3, %v3364_v31 }
 0xcdf   :  { %2685 = vmatpush3.bf16.msra.mxu1 %v2684_v32  ;;  %2507 = vmatprep.mubr.msk.f32.mxu1 %vm3066_vm2, %v3067_v14 }
 0xce0   :  { %2703 = vmatprep.subr.bf16.mxu1 %v3367_v34 }
 0xce2   :  { %2508 = vmatmul.mubr.msk.f32.vlgmr.msra.gmra.mrb[18].mxu1 %vm309_vm3, %v3373_v36 }
 0xce3   :  { %2705 = vmatpush3.bf16.msra.mxu1 %v3367_v34  ;;  %2537 = vmatprep.mubr.msk.f32.mxu1 %vm210_vm0, %v3520_v25 }
 0xce4   :  { %2707 = vmatprep.subr.bf16.mxu1 %v3381_v39 }
 0xce7   :  { %2709 = vmatpush3.bf16.msra.mxu1 %v3381_v39 }
 0xce8   :  { %2711 = vmatprep.subr.bf16.mxu1 %v3398_v52 }
 0xcea   :  { %2538 = vmatmul.mubr.msk.f32.vlgmr.msra.gmra.mrb[20].mxu1 %vm210_vm0, %v3523_v26 }
 0xceb   :  { %2713 = vmatpush3.bf16.msra.mxu1 %v3398_v52 }
 0xcec   :  { %2715 = vmatprep.subr.bf16.mxu1 %v3400_v54 }
 0xcef   :  { %2717 = vmatpush3.bf16.msra.mxu1 %v3400_v54 }
 0xdb1   :  { %v1500_v8 = vpop.f32.mrb[16].mxu1 }
 0xdb2   :  { %v2502_v14 = vpop.f32.mrb[17].mxu1  ;;  %2526 = vmatprep.mubr.msk.f32.mxu0 %vm292_vm1, %v1500_v8 }
 0xdb5   :  { %v1570_v31 = vpop.f32.mrb[18].mxu1 }
 0xdb6   :  { %v2509_v34 = vpop.f32.mrb[19].mxu1  ;;  %2527 = vmatmul.mubr.msk.f32.vlgmr.msra.gmra.mrb[10].mxu0 %vm292_vm1, %v1570_v31 }
 0xdb7   :  { %2555 = vmatprep.mubr.msk.f32.mxu0 %vm309_vm3, %v1889_v62  ;;  %2721 = vmatpush3.bf16.msra.mxu0 %v2718_v63  ;;  %v2066_v34 = vld [vmem:[#allocation17] sm:$0xff] }
 0xdb8   :  { %2723 = vmatprep.subr.bf16.mxu0 %v2722_v2 }
 0xdbd   :  { %v2539_v36 = vpop.f32.mrb[20].mxu1 }
 0xdbe   :  { %v1721_v39 = vpop.f32.mrb[21].mxu1 }
 0xe89   :  { %v2528_v33 = vpop.f32.mrb[10].mxu0 }
 0xe8a   :  { %v1731_v3 = vadd.f32 %v2539_v36, %v2528_v33  ;;  %v1646_v35 = vpop.f32.mrb[11].mxu0  ;;  %v2067_v36 = vld [vmem:[#allocation17 + $0x8] sm:$0xff] }
 0xe8b   :  { %v1730_v37 = vadd.f32 %v1721_v39, %v1646_v35  ;;  %v2068_v39 = vld [vmem:[#allocation17 + $0x10] sm:$0xff] }
 0xe8c   :  { %v1733_v52 = vadd.f32 %v3410_v55, %v1731_v3  ;;  %v1747_v16 = vadd.f32 %v1731_v3, %v3439_v38  ;;  %v2069_v3 = vld [vmem:[#allocation17 + $0x18] sm:$0xff] }
 0xe8d   :  { %v1732_v6 = vadd.f32 %v3410_v55, %v1730_v37  ;;  %v1746_v17 = vadd.f32 %v1730_v37, %v3439_v38 }
 0xe8e   :  { %v2222_v40 = vmul.f32 -1.442695, %v1733_v52  ;;  %v2224_v19 = vmul.f32 -1.442695, %v1747_v16 }
 0xe8f   :  { %v2221_v54 = vmul.f32 -1.442695, %v1732_v6  ;;  %v2223_v21 = vmul.f32 -1.442695, %v1746_v17 }
 0xe90   :  { %2798 = vpow2.f32 %v2222_v40 }
 0xe91   :  { %2800 = vpow2.f32 %v2221_v54 }
 0xe9a   :  { %v2799_v41 = vpop.eup %2798 }
 0xe9b   :  { %v1741_v43 = vadd.f32 1.0, %v2799_v41  ;;  %v2801_v44 = vpop.eup %2800  ;;  %v2232_v41 = vld [vmem:[%s3641_s15] ss:$0 sm:$0xff] }
 0xe9c   :  { %v1740_v45 = vadd.f32 1.0, %v2801_v44 }
 0xe9d   :  { %2802 = vrcp.f32 %v1741_v43 }
 0xe9e   :  { %2804 = vrcp.f32 %v1740_v45 }
 0xea7   :  { %v2803_v46 = vpop.eup %2802 }
 0xea8   :  { %v2805_v47 = vpop.eup %2804  ;;  %v1761_v49 = vmul.f32 %v2803_v46, %v3523_v26 }
 0xea9   :  { %v1760_v48 = vmul.f32 %v2805_v47, %v3520_v25 }
 0xeab   :  { %2548 = vmatprep.mubr.msk.f32.mxu1 %vm210_vm0, %v1760_v48 }
 0xeac   :  { %2549 = vmatmul.mubr.msk.f32.vlgmr.msra.gmra.mrb[22].mxu1 %vm210_vm0, %v1761_v49 }
 0xf7f   :  { %v2550_v55 = vpop.f32.mrb[22].mxu1 }
 0xf80   :  { %1847 = vrot.lane.b32.xlu1 %v2550_v55, %s3068_s17  ;;  %v1834_v50 = vpop.f32.mrb[23].mxu1 }
 0xf81   :  { %1845 = vrot.lane.b32.xlu0 %v1834_v50, %s3068_s17 }
 0xf84   :  { %1859 = vrot.lane.b32.xlu1 %v3523_v26, %s3068_s17 }
 0xf85   :  { %1857 = vrot.lane.b32.xlu0 %v3520_v25, %s3068_s17 }
 0xff2   :  { %v1848_v51 = vpop.permute.xlu1 %1847 }
 0xff3   :  { %v1852_v53 = vadd.f32 %v2528_v33, %v1848_v51  ;;  %v1846_v56 = vpop.permute.xlu0 %1845  ;;  %v2730_v33 = vpack.c.bf16 %v2067_v36, %v2066_v34 }
 0xff4   :  { %v1851_v58 = vadd.f32 %v1846_v56, %v1646_v35  ;;  %v2734_v35 = vpack.c.bf16 %v2069_v3, %v2068_v39 }
 0xff5   :  { %v1854_v57 = vadd.f32 %v1852_v53, %v3433_v22  ;;  %2731 = vmatprep.subr.bf16.mxu1 %v2730_v33 }
 0xff6   :  { %v1853_v60 = vadd.f32 %v1851_v58, %v3433_v22  ;;  %v1890_v22 = vld [vmem:[#allocation6 + $0x8] sm:$0xff]  ;;  %v1860_v10 = vpop.permute.xlu1 %1859  ;;  %2733 = vmatpush3.bf16.msra.mxu1 %v2730_v33 }
 0xff7   :  { %2806 = vtanh.f32 %v1854_v57  ;;  %2556 = vmatmul.mubr.msk.f32.vlgmr.msra.gmra.mrb[12].mxu0 %vm309_vm3, %v1890_v22  ;;  %v1858_v13 = vpop.permute.xlu0 %1857  ;;  %2735 = vmatprep.subr.bf16.mxu1 %v2734_v35 }
 0xff8   :  { %2808 = vtanh.f32 %v1853_v60  ;;  %2725 = vmatpush3.bf16.msra.mxu0 %v2722_v2 }
 0xff9   :  { %2810 = vpow2.f32 %v2224_v19  ;;  %2727 = vmatprep.subr.bf16.mxu0 %v2726_v20 }
 0xffa   :  { %2812 = vpow2.f32 %v2223_v21  ;;  %2737 = vmatpush3.bf16.msra.mxu1 %v2734_v35 }
 0xffc   :  { %2729 = vmatpush3.bf16.msra.mxu0 %v2726_v20 }
0x1001   :  { %v2807_v4 = vpop.eup %2806 }
0x1002   :  { %v2809_v11 = vpop.eup %2808  ;;  %v1864_v12 = vsub.f32 %v2807_v4, %v1860_v10 }
0x1003   :  { %v1863_v15 = vsub.f32 %v2809_v11, %v1858_v13  ;;  %v2811_v24 = vpop.eup %2810 }
0x1004   :  { %1869 = vrot.lane.b32.xlu1 %v1864_v12, %s3070_s10  ;;  %v2813_v59 = vpop.eup %2812  ;;  %v1755_v61 = vadd.f32 1.0, %v2811_v24 }
0x1005   :  { %1867 = vrot.lane.b32.xlu0 %v1863_v15, %s3070_s10  ;;  %v1754_v27 = vadd.f32 1.0, %v2813_v59 }
0x1006   :  { %2814 = vrcp.f32 %v1755_v61 }
0x1007   :  { %2816 = vrcp.f32 %v1754_v27 }
0x1010   :  { %v2815_v38 = vpop.eup %2814 }
0x1011   :  { %v2817_v42 = vpop.eup %2816 }
0x1076   :  { %v1870_v23 = vpop.permute.xlu1 %1869 }
0x1077   :  { %v1874_v29 = vmul.f32 %v2815_v38, %v1870_v23  ;;  %v1868_v30 = vpop.permute.xlu0 %1867 }
0x1078   :  { %v1873_v9 = vmul.f32 %v2817_v42, %v1868_v30 }
0x1079   :  { %1879 = vrot.lane.b32.xlu1 %v1874_v29, %s3070_s10 }
0x107a   :  { %1877 = vrot.lane.b32.xlu0 %v1873_v9, %s3070_s10 }
0x10eb   :  { %v1880_v32 = vpop.permute.xlu1 %1879 }
0x10ec   :  { %v1878_v8 = vpop.permute.xlu0 %1877  ;;  %v1884_v31 = vadd.f32 %v1880_v32, %v3523_v26 }
0x10ed   :  { %v1883_v14 = vadd.f32 %v1878_v8, %v3520_v25  ;;  %v2231_v25 = vld [vmem:[%s3639_s13] ss:$0 sm:$0xff]  ;;  %s3020_s13 = scalar_lea.vmem %s2166_s7, 256 }
0x10ee   :  { %p3021_p2 = scmp.ne.s32.totalorder %s2166_s7, %s3020_s13  ;;  %p3026_p4 = scmp.lt.s32.totalorder %s3020_s13, %s3020_s13 }
0x10ef   :  { %2566 = vmatprep.mubr.msk.f32.mxu0 %vm210_vm0, %v1883_v14 }
0x10f0   :  { %2567 = vmatmul.mubr.msk.f32.vlgmr.msra.gmra.mrb[12].mxu0 %vm210_vm0, %v1884_v31  ;;  %p3027_p5 = por %p3026_p4, %p3025_p3 }
0x10f2   :  { %p3028_p6 = pnand %p3027_p5, %p3021_p2 }
0x11c3   :  { %v2568_v37 = vpop.f32.mrb[12].mxu0 }
0x11c4   :  { %v2063_v26 = vadd.f32 %v2568_v37, %v2231_v25  ;;  %v2046_v52 = vpop.f32.mrb[13].mxu0 }
0x11c5   :  { %v2062_v6 = vadd.f32 %v2231_v25, %v2046_v52 }
0x11c7   :  { %2818 = vtanh.f32 %v2062_v6 }
0x11c8   :  { %2820 = vtanh.f32 %v2063_v26 }
0x11d1   :  { %v2819_v40 = vpop.eup %2818 }
0x11d2   :  { %v2821_v54 = vpop.eup %2820  ;;  %2577 = vmatprep.mubr.msk.f32.mxu1 %vm210_vm0, %v2819_v40 }
0x11d3   :  { %2578 = vmatmul.mubr.msk.f32.vlgmr.msra.gmra.mrb[24].mxu1 %vm210_vm0, %v2821_v54 }
0x12a6   :  { %v2579_v43 = vpop.f32.mrb[24].mxu1 }
0x12a7   :  { %v2155_v44 = vadd.f32 %v2579_v43, %v2232_v41  ;;  %v2149_v45 = vpop.f32.mrb[25].mxu1 }
0x12a8   :  { %v2150_v46 = vadd.f32 %v2232_v41, %v2149_v45 }
0x12a9   :  { %2159 = vst [vmem:[#allocation18 + $0x8] sm:$0xff] %v2155_v44 }
0x12aa   :  { %2158 = vst [vmem:[#allocation18] sm:$0xff] %v2150_v46 }
0x12ab   :  { %3031 = shalt.err (!%p3028_p6)
}
0x12ac   :  { %s3032_s15 = scalar_lea.hbm %s3642_s16, 256 }
0x12ad   :  { %p3033_p7 = scmp.ne.s32.totalorder %s3642_s16, %s3032_s15  ;;  %p3036_p8 = scmp.lt.u32.totalorder %s3032_s15, %s3642_s16 }
0x12af   :  { %p3038_p9 = pnand %p3036_p8, %p3033_p7 }
0x12b1   :  { %3041 = shalt.err (!%p3038_p9)
}
0x12b2   :  { %2171 = dma.vmem_to_hbm [thread:$0]  %s2166_s7, 256, %s3642_s16, [#allocation5], %s3056_s18, %s3056_s18, %s3057_s19  }
0x12b3   :  { %3052 = dma.done.wait [#allocation5], 256  }
0x12b4   :  { %3053 = vsyncadd [#allocation5], 4294967040 }
0x12b5   :  { %2175 = vsyncpa [#allocation4], 1 }
0x12b6   :  { %2176 = vsyncpa [#allocation7], 1 }
0x12b7   :  { %2177 = vsyncpa [#allocation10], 1 }
0x12b8   :  { %2178 = vsyncpa [#allocation13], 1 }
0x12b9   :  { %2179 = vsyncpa [#allocation16], 1 }
0x12ba   :  { %2180 = vsyncpa [#allocation5], 1 }

</bundles_post_ra>
